<compile_context>
chip_gen: v5e
topology: v5e:2x2
jax: 0.10.0
libtpu: 0.0.40
codegen_flags: <defaults>
</compile_context>

<pallas_src>
import numpy as np
import jax
import jax.numpy as jnp
from jax.experimental import pallas as pl
from jax.experimental.pallas import tpu as pltpu

LEAKY_SLOPE = 0.01
SKIP_WEIGHT_H = 0.5
X_CONNECTION_INIT = 0.25
REC_SQ_DIST_SCALE = 1.5
ALL_SIGMAS = [1.5 ** k for k in range(15)]
OUT_LANES = 128          # lane-dense output slab width (>= F + 3)


def _leaky(x):
    return jnp.where(x >= 0, x, LEAKY_SLOPE * x)


# --------------------------------------------------------------------------
# Pallas kernel: one grid step == one graph branch (0 = ligand, 1 = receptor)
# --------------------------------------------------------------------------
def _iegmn_kernel(x_ref, h_ref, ef_ref, ssrc_ref, sdst_ref, adjt_ref,
                  invdeg_ref, origh_ref, origx_ref, invsig_ref,
                  wsd_ref, wefrbf_ref, be1_ref, we2_ref, be2_ref,
                  wn1_ref, bn1_ref, wn2_ref, bn2_ref,
                  wc1_ref, bc1_ref, wc2_ref, bc2_ref,
                  out_ref):
    f32 = jnp.float32
    bf16 = jnp.bfloat16
    F = we2_ref.shape[1]                         # out_feats_dim (static)

    x = x_ref[...]                               # [N, 3]  f32
    h = h_ref[...]                               # [N, H]  f32
    inv_deg = invdeg_ref[...]                    # [N, 1]  f32

    # Exact-ish bf16 hi/lo split of coordinates so the 0/1 selector matmul
    # reproduces x_src - x_dst to ~16 mantissa bits (f32 accumulation).
    x_hi = x.astype(bf16)
    x_lo = (x - x_hi.astype(f32)).astype(bf16)

    # ---- fused src/dst projection: one matmul, 2F output lanes ----
    p = jnp.dot(h.astype(bf16), wsd_ref[...], preferred_element_type=f32)   # [N, 2F]
    p_b = p.astype(bf16)

    # ---- per-edge gathers: feature projection + coordinates share one
    #      [E,N]@[N,F+6] selector matmul per endpoint ----
    q_src = jnp.concatenate([p_b[:, :F], x_hi, x_lo], axis=-1)              # [N, F+6]
    q_dst = jnp.concatenate([p_b[:, F:], x_hi, x_lo], axis=-1)              # [N, F+6]
    g_src = jnp.dot(ssrc_ref[...], q_src, preferred_element_type=f32)       # [E, F+6]
    g_dst = jnp.dot(sdst_ref[...], q_dst, preferred_element_type=f32)       # [E, F+6]

    pre_h = g_src[:, :F] + g_dst[:, :F]                                     # [E, F]
    x_src = g_src[:, F:F + 3] + g_src[:, F + 3:F + 6]
    x_dst = g_dst[:, F:F + 3] + g_dst[:, F + 3:F + 6]
    x_rel = x_src - x_dst                                                   # [E, 3] f32

    # ---- RBF distance features (f32 elementwise; inv_sig already folds the
    #      receptor's 1/rec_square_distance_scale) ----
    sq = jnp.sum(x_rel * x_rel, axis=-1, keepdims=True)                     # [E, 1]
    rbf = jnp.exp(-sq * invsig_ref[...])                                    # [E, 15]

    # ---- edge MLP: Linear -> LeakyReLU -> Identity -> Linear ----
    ef_rbf = jnp.concatenate([ef_ref[...], rbf], axis=-1).astype(bf16)      # [E, EFw+15]
    pre = (pre_h
           + jnp.dot(ef_rbf, wefrbf_ref[...], preferred_element_type=f32)
           + be1_ref[...])                                                  # [E, F]
    msg = (jnp.dot(_leaky(pre).astype(bf16), we2_ref[...],
                   preferred_element_type=f32) + be2_ref[...])              # [E, F]
    msg_b = msg.astype(bf16)                                                # cached

    # ---- coords MLP coefficient (ligand slot carries zero weights -> coef==0;
    #      keeps the two grid steps balanced, gated out of the output below) ----
    c1 = _leaky(jnp.dot(msg_b, wc1_ref[...], preferred_element_type=f32)
                + bc1_ref[...])                                             # [E, F]
    coef = (jnp.sum(c1 * wc2_ref[...], axis=-1, keepdims=True)
            + bc2_ref[...])                                                 # [E, 1]

    m = x_rel * coef                                                        # [E, 3] f32
    m_hi = m.astype(bf16)
    m_lo = (m - m_hi.astype(f32)).astype(bf16)

    # ---- fused mean aggregation: msg columns + coord hi/lo columns in ONE
    #      [N,E]@[E,F+6] matmul (fn.copy_edge/fn.mean + coordinate update) ----
    packed = jnp.concatenate([msg_b, m_hi, m_lo], axis=-1)                  # [E, F+6]
    agg = jnp.dot(adjt_ref[...], packed, preferred_element_type=f32)        # [N, F+6]
    aggr_msg = agg[:, :F] * inv_deg                                         # [N, F]
    x_upd = (agg[:, F:F + 3] + agg[:, F + 3:F + 6]) * inv_deg               # [N, 3]

    # ---- node MLP (fused first layer) with residual skip ----
    node_in = jnp.concatenate([h, aggr_msg, origh_ref[...]],
                              axis=-1).astype(bf16)                         # [N, H+F+OH]
    nh = (jnp.dot(node_in, wn1_ref[...], preferred_element_type=f32)
          + bn1_ref[...])                                                   # [N, H]
    node_out = (jnp.dot(_leaky(nh).astype(bf16), wn2_ref[...],
                        preferred_element_type=f32) + bn2_ref[...])         # [N, F]
    h_out = SKIP_WEIGHT_H * node_out + (1.0 - SKIP_WEIGHT_H) * h            # [N, F]

    # ---- coordinate output: receptor evolves, ligand passes coords through
    #      (matches reference forward()).  Scalar gate -> ONE unconditional
    #      lane-dense store; no duplicated concat under pl.when. ----
    x_evolved = (X_CONNECTION_INIT * origx_ref[...]
                 + (1.0 - X_CONNECTION_INIT) * x + x_upd)                   # [N, 3]
    gate = (pl.program_id(0) == 1).astype(f32)
    x_out = gate * x_evolved + (1.0 - gate) * x

    n_rows = h_out.shape[0]
    pad = jnp.zeros((n_rows, out_ref.shape[-1] - F - 3), f32)
    out_ref[...] = jnp.concatenate([h_out, x_out, pad], axis=-1)


def _branch_spec(a):
    # leading axis = branch (squeezed), last two dims = full array extent
    return pl.BlockSpec((None,) + tuple(a.shape[1:]), lambda g: (g, 0, 0))


# --------------------------------------------------------------------------
# Host-side wrapper: stack both branches, build fused weights, one pallas_call
# --------------------------------------------------------------------------
def iegmn_layer_forward(lig_graph, rec_graph,
                        coords_lig, h_feats_lig, orig_lig_feats, orig_coords_lig,
                        coords_rec, h_feats_rec, orig_rec_feats, orig_coords_rec,
                        params_lig, params_rec, inv_sig_lig, inv_sig_rec):
    n = coords_lig.shape[0]
    assert coords_rec.shape[0] == n, "branches padded to a common node count"
    e = lig_graph["s_src"].shape[0]
    assert rec_graph["s_src"].shape[0] == e, "branches padded to a common edge count"
    h_dim = h_feats_lig.shape[1]
    f_dim = params_rec["w_e2"].shape[1]
    oh_dim = orig_lig_feats.shape[1]
    assert f_dim + 3 <= OUT_LANES, "h_out + xyz must fit the lane-dense output slab"

    bf16 = jnp.bfloat16
    # common edge-feature width (zero padding is exact)
    ef_w = max(lig_graph["efeat"].shape[1], rec_graph["efeat"].shape[1])

    def pad_cols(a, w):
        return jnp.pad(a, ((0, 0), (0, w - a.shape[1])))

    def pad_rows(a, r):
        return jnp.pad(a, ((0, r - a.shape[0]), (0, 0)))

    def pstack(name, dtype=jnp.float32):
        return jnp.stack([params_lig[name], params_rec[name]], 0).astype(dtype)

    def gstack(name, dtype):
        return jnp.stack([lig_graph[name], rec_graph[name]], 0).astype(dtype)

    ef = jnp.stack([pad_cols(lig_graph["efeat"], ef_w),
                    pad_cols(rec_graph["efeat"], ef_w)], 0)
    # fused [W_src | W_dst] projection weight (one matmul, 2F lanes)
    w_sd = jnp.stack(
        [jnp.concatenate([params_lig["w_src"], params_lig["w_dst"]], 1),
         jnp.concatenate([params_rec["w_src"], params_rec["w_dst"]], 1)],
        0).astype(bf16)
    # fused [edge_feat | rbf] weight for the edge-MLP first layer
    w_efrbf = jnp.stack(
        [jnp.concatenate([pad_rows(params_lig["w_ef"], ef_w),
                          params_lig["w_rbf"]], 0),
         jnp.concatenate([pad_rows(params_rec["w_ef"], ef_w),
                          params_rec["w_rbf"]], 0)], 0).astype(bf16)
    # fused [h | aggr_msg | orig_h] weight for the node-MLP first layer
    w_n1 = jnp.stack(
        [jnp.concatenate([params_lig["w_nh"], params_lig["w_nm"],
                          params_lig["w_no"]], 0),
         jnp.concatenate([params_rec["w_nh"], params_rec["w_nm"],
                          params_rec["w_no"]], 0)], 0).astype(bf16)
    # ligand slot has no coords MLP in this forward(); zero weights keep the
    # two grid steps identical (balanced) and coef==0 is gated out of the
    # ligand output by the program_id select in the kernel.
    w_c1 = jnp.stack([jnp.zeros_like(params_rec["w_c1"]),
                      params_rec["w_c1"]], 0).astype(bf16)
    b_c1 = jnp.stack([jnp.zeros_like(params_rec["b_c1"]), params_rec["b_c1"]], 0)
    w_c2 = jnp.stack([jnp.zeros_like(params_rec["w_c2"]), params_rec["w_c2"]], 0)
    b_c2 = jnp.stack([jnp.zeros_like(params_rec["b_c2"]), params_rec["b_c2"]], 0)

    inputs = [
        jnp.stack([coords_lig, coords_rec], 0),            # x        [2,N,3]   f32
        jnp.stack([h_feats_lig, h_feats_rec], 0),          # h        [2,N,H]   f32
        ef,                                                # efeat    [2,E,EFw] f32
        gstack("s_src", bf16),                             # [2,E,N]  bf16 0/1
        gstack("s_dst", bf16),                             # [2,E,N]  bf16 0/1
        gstack("adj_t", bf16),                             # [2,N,E]  bf16 0/1
        gstack("inv_deg", jnp.float32),                    # [2,N,1]  f32
        jnp.stack([orig_lig_feats, orig_rec_feats], 0),    # [2,N,OH] f32
        jnp.stack([orig_coords_lig, orig_coords_rec], 0),  # [2,N,3]  f32
        jnp.stack([inv_sig_lig, inv_sig_rec], 0),          # [2,1,15] f32
        w_sd, w_efrbf,
        pstack("b_e1"), pstack("w_e2", bf16), pstack("b_e2"),
        w_n1, pstack("b_n1"), pstack("w_n2", bf16), pstack("b_n2"),
        w_c1, b_c1, w_c2, b_c2,
    ]

    efr = ef_w + 15
    macs_branch = (n * h_dim * 2 * f_dim            # fused src/dst projection
                   + 2 * e * n * (f_dim + 6)        # selector gathers (feat + coord hi/lo)
                   + e * efr * f_dim                # edge-MLP layer 1 ([ef|rbf] part)
                   + 2 * e * f_dim * f_dim          # edge-MLP layer 2 + coords-MLP layer 1
                   + e * f_dim                      # coords-MLP layer 2
                   + n * e * (f_dim + 6)            # fused mean aggregation
                   + n * (h_dim + f_dim + oh_dim) * h_dim   # node-MLP layer 1
                   + n * h_dim * f_dim)             # node-MLP layer 2
    bytes_in = sum(int(a.size) * a.dtype.itemsize for a in inputs)
    cost = pl.CostEstimate(
        flops=2 * 2 * macs_branch,
        transcendentals=2 * e * 15,
        bytes_accessed=bytes_in + 2 * n * OUT_LANES * 4)

    out = pl.pallas_call(
        _iegmn_kernel,
        out_shape=jax.ShapeDtypeStruct((2, n, OUT_LANES), jnp.float32),
        grid=(2,),
        in_specs=[_branch_spec(a) for a in inputs],
        out_specs=pl.BlockSpec((None, n, OUT_LANES), lambda g: (g, 0, 0)),
        compiler_params=pltpu.CompilerParams(
            # grid=(2,) is a serial loop on single-TC v5e/v6e; on v7x the two
            # (now balanced) branch steps can be sharded across TensorCores.
            dimension_semantics=("parallel",),
            # bf16 selectors/adjacency/weights ~halve the working set; 64 MiB
            # leaves pipelining headroom on v7x (64 MiB/TC) and fits easily in
            # v5e/v6e's 128 MiB physical VMEM.
            vmem_limit_bytes=64 * 1024 * 1024),
        cost_estimate=cost,
    )(*inputs)

    node_upd_lig = out[0, :, :f_dim]
    node_upd_rec = out[1, :, :f_dim]
    x_evolved_rec = out[1, :, f_dim:f_dim + 3]
    x_evolved_lig = coords_lig        # forward() never updates ligand coords
    geom_loss = 0.0
    return (x_evolved_lig, node_upd_lig, x_evolved_rec, node_upd_rec, None,
            geom_loss)


# --------------------------------------------------------------------------
# Setup helpers (plain JAX / numpy glue)
# --------------------------------------------------------------------------
def init_params(key, H, F, OH, Ein, with_coords):
    ks = jax.random.split(key, 17)

    def w(k, shape, scale=0.1):
        return (scale * jax.random.normal(k, shape)).astype(jnp.float32)

    p = {
        "w_src": w(ks[0], (H, F)), "w_dst": w(ks[1], (H, F)),
        "w_ef": w(ks[2], (Ein, F)), "w_rbf": w(ks[3], (15, F)),
        "b_e1": w(ks[4], (1, F)),
        "w_e2": w(ks[5], (F, F)), "b_e2": w(ks[6], (1, F)),
        "w_nh": w(ks[7], (H, H)), "w_nm": w(ks[8], (F, H)),
        "w_no": w(ks[9], (OH, H)), "b_n1": w(ks[10], (1, H)),
        "w_n2": w(ks[11], (H, F)), "b_n2": w(ks[12], (1, F)),
    }
    if with_coords:
        p.update({
            "w_c1": w(ks[13], (F, F)), "b_c1": w(ks[14], (1, F)),
            "w_c2": w(ks[15], (1, F)),
            "b_c2": w(ks[16], (1, 1)),
        })
    return p


def build_graph(n_nodes):
    # complete directed graph (no self loops) -> deterministic edge list
    src, dst = [], []
    for u in range(n_nodes):
        for v in range(n_nodes):
            if u != v:
                src.append(u)
                dst.append(v)
    src = np.asarray(src, np.int32)
    dst = np.asarray(dst, np.int32)
    eye = np.eye(n_nodes, dtype=np.float32)
    s_src = eye[src]                              # [E, N]
    s_dst = eye[dst]                              # [E, N]
    deg = s_dst.sum(axis=0)                       # in-degree [N]
    return {
        "src_idx": jnp.asarray(src),
        "dst_idx": jnp.asarray(dst),
        "deg": jnp.asarray(deg, jnp.float32),
        # 0/1 selector / adjacency matrices are exact in bf16 (halves HBM/VMEM)
        "s_src": jnp.asarray(s_src, jnp.bfloat16),                     # [E, N]
        "s_dst": jnp.asarray(s_dst, jnp.bfloat16),                     # [E, N]
        "adj_t": jnp.asarray(s_dst.T.copy(), jnp.bfloat16),            # [N, E]
        # mean over incoming edges; 1/max(deg,1) returns 0 for isolated nodes
        # (matches DGL fn.mean which leaves zero-in-degree nodes untouched)
        "inv_deg": jnp.asarray((1.0 / np.maximum(deg, 1.0))[:, None],
                               jnp.float32),                           # [N, 1]
    }


# pure-JAX reference mirroring the torch/DGL formulation (concat + scatter)
def ref_branch(coords, h, efeat, src_idx, dst_idx, deg, orig_h, inv_sig,
               params, evolve, orig_coords=None):
    x_rel = coords[src_idx] - coords[dst_idx]
    sq = jnp.sum(x_rel * x_rel, axis=1, keepdims=True)
    rbf = jnp.exp(-sq * inv_sig)
    W1 = jnp.concatenate([params["w_src"], params["w_dst"],
                          params["w_ef"], params["w_rbf"]], axis=0)
    edge_in = jnp.concatenate([h[src_idx], h[dst_idx], efeat, rbf], axis=1)
    msg = (_leaky(edge_in @ W1 + params["b_e1"]) @ params["w_e2"]
           + params["b_e2"])
    n = coords.shape[0]
    aggr = jnp.zeros((n, msg.shape[1]), jnp.float32).at[dst_idx].add(msg)
    aggr = aggr / deg[:, None]
    Wn1 = jnp.concatenate([params["w_nh"], params["w_nm"], params["w_no"]], 0)
    node_in = jnp.concatenate([h, aggr, orig_h], axis=1)
    node_out = (_leaky(node_in @ Wn1 + params["b_n1"]) @ params["w_n2"]
                + params["b_n2"])
    h_out = SKIP_WEIGHT_H * node_out + (1.0 - SKIP_WEIGHT_H) * h
    if not evolve:
        return h_out
    c1 = _leaky(msg @ params["w_c1"] + params["b_c1"])
    coef = jnp.sum(c1 * params["w_c2"], axis=-1, keepdims=True) + params["b_c2"]
    m = x_rel * coef
    x_upd = jnp.zeros((n, 3), jnp.float32).at[dst_idx].add(m) / deg[:, None]
    x_out = (X_CONNECTION_INIT * orig_coords
             + (1.0 - X_CONNECTION_INIT) * coords + x_upd)
    return x_out, h_out


# --------------------------------------------------------------------------
if __name__ == "__main__":
    key = jax.random.PRNGKey(0)
    N_LIG = N_REC = 8
    H, F, OH = 32, 32, 16          # h_feats_dim = out_feats_dim, orig dim
    LIG_EF, REC_EF = 8, 6          # edge input feature dims

    (k_pl, k_pr, k1, k2, k3, k4, k5, k6, k7, k8, k9, k10) = jax.random.split(key, 12)
    params_lig = init_params(k_pl, H, F, OH, LIG_EF, with_coords=False)
    params_rec = init_params(k_pr, H, F, OH, REC_EF, with_coords=True)

    g_lig = build_graph(N_LIG)
    g_rec = build_graph(N_REC)
    E_lig = g_lig["s_src"].shape[0]
    E_rec = g_rec["s_src"].shape[0]

    coords_lig = jax.random.normal(k1, (N_LIG, 3), jnp.float32)
    h_lig = jax.random.normal(k2, (N_LIG, H), jnp.float32)
    orig_h_lig = jax.random.normal(k3, (N_LIG, OH), jnp.float32)
    orig_coords_lig = jax.random.normal(k4, (N_LIG, 3), jnp.float32)
    coords_rec = jax.random.normal(k5, (N_REC, 3), jnp.float32)
    h_rec = jax.random.normal(k6, (N_REC, H), jnp.float32)
    orig_h_rec = jax.random.normal(k7, (N_REC, OH), jnp.float32)
    orig_coords_rec = jax.random.normal(k8, (N_REC, 3), jnp.float32)
    g_lig["efeat"] = jax.random.normal(k9, (E_lig, LIG_EF), jnp.float32)
    g_rec["efeat"] = jax.random.normal(k10, (E_rec, REC_EF), jnp.float32)

    inv_sig = jnp.asarray([[1.0 / s for s in ALL_SIGMAS]], jnp.float32)
    inv_sig_lig = inv_sig                               # exp(-d2/sigma)
    inv_sig_rec = inv_sig / REC_SQ_DIST_SCALE           # exp(-(d2/scale)/sigma)

    outs = iegmn_layer_forward(
        g_lig, g_rec,
        coords_lig, h_lig, orig_h_lig, orig_coords_lig,
        coords_rec, h_rec, orig_h_rec, orig_coords_rec,
        params_lig, params_rec, inv_sig_lig, inv_sig_rec)
    x_ev_lig, h_upd_lig, x_ev_rec, h_upd_rec, _, geom_loss = outs
    jax.block_until_ready((h_upd_lig, x_ev_rec, h_upd_rec))

    assert x_ev_lig.shape == (N_LIG, 3)
    assert h_upd_lig.shape == (N_LIG, F)
    assert x_ev_rec.shape == (N_REC, 3)
    assert h_upd_rec.shape == (N_REC, F)

    # reference check: full-f32 ground truth (kernel uses bf16 MXU operands
    # with f32 accumulation, hence the bf16-appropriate tolerance).
    with jax.default_matmul_precision("highest"):
        ref_h_lig = ref_branch(coords_lig, h_lig, g_lig["efeat"],
                               g_lig["src_idx"], g_lig["dst_idx"], g_lig["deg"],
                               orig_h_lig, inv_sig_lig, params_lig, evolve=False)
        ref_x_rec, ref_h_rec = ref_branch(
            coords_rec, h_rec, g_rec["efeat"], g_rec["src_idx"],
            g_rec["dst_idx"], g_rec["deg"], orig_h_rec, inv_sig_rec,
            params_rec, evolve=True, orig_coords=orig_coords_rec)

    TOL = dict(rtol=4e-2, atol=4e-2)
    assert np.allclose(np.asarray(h_upd_lig), np.asarray(ref_h_lig), **TOL)
    assert np.allclose(np.asarray(h_upd_rec), np.asarray(ref_h_rec), **TOL)
    assert np.allclose(np.asarray(x_ev_rec), np.asarray(ref_x_rec), **TOL)
    assert np.allclose(np.asarray(x_ev_lig), np.asarray(coords_lig))

    print("KERNEL_OK")
</pallas_src>

<mosaic_0001>
module attributes {stable_mosaic.version = 11 : i64} {
  func.func @_iegmn_kernel(%arg0: i32, %arg1: memref<1x8x3xf32, #tpu.memory_space<vmem>>, %arg2: memref<1x8x32xf32, #tpu.memory_space<vmem>>, %arg3: memref<1x56x8xf32, #tpu.memory_space<vmem>>, %arg4: memref<1x56x8xbf16, #tpu.memory_space<vmem>>, %arg5: memref<1x56x8xbf16, #tpu.memory_space<vmem>>, %arg6: memref<1x8x56xbf16, #tpu.memory_space<vmem>>, %arg7: memref<1x8x1xf32, #tpu.memory_space<vmem>>, %arg8: memref<1x8x16xf32, #tpu.memory_space<vmem>>, %arg9: memref<1x8x3xf32, #tpu.memory_space<vmem>>, %arg10: memref<1x1x15xf32, #tpu.memory_space<vmem>>, %arg11: memref<1x32x64xbf16, #tpu.memory_space<vmem>>, %arg12: memref<1x23x32xbf16, #tpu.memory_space<vmem>>, %arg13: memref<1x1x32xf32, #tpu.memory_space<vmem>>, %arg14: memref<1x32x32xbf16, #tpu.memory_space<vmem>>, %arg15: memref<1x1x32xf32, #tpu.memory_space<vmem>>, %arg16: memref<1x80x32xbf16, #tpu.memory_space<vmem>>, %arg17: memref<1x1x32xf32, #tpu.memory_space<vmem>>, %arg18: memref<1x32x32xbf16, #tpu.memory_space<vmem>>, %arg19: memref<1x1x32xf32, #tpu.memory_space<vmem>>, %arg20: memref<1x32x32xbf16, #tpu.memory_space<vmem>>, %arg21: memref<1x1x32xf32, #tpu.memory_space<vmem>>, %arg22: memref<1x1x32xf32, #tpu.memory_space<vmem>>, %arg23: memref<1x1x1xf32, #tpu.memory_space<vmem>>, %arg24: memref<1x8x128xf32, #tpu.memory_space<vmem>>) attributes {dimension_semantics = [#tpu.dimension_semantics<parallel>], iteration_bounds = array<i64: 2>, scalar_prefetch = 0 : i64, scratch_operands = 0 : i64, tpu.core_type = #tpu.core_type<tc>, window_params = [{transform_indices = @transform_0, window_bounds = array<i64: 1, 8, 3>}, {transform_indices = @transform_1, window_bounds = array<i64: 1, 8, 32>}, {transform_indices = @transform_2, window_bounds = array<i64: 1, 56, 8>}, {transform_indices = @transform_3, window_bounds = array<i64: 1, 56, 8>}, {transform_indices = @transform_4, window_bounds = array<i64: 1, 56, 8>}, {transform_indices = @transform_5, window_bounds = array<i64: 1, 8, 56>}, {transform_indices = @transform_6, window_bounds = array<i64: 1, 8, 1>}, {transform_indices = @transform_7, window_bounds = array<i64: 1, 8, 16>}, {transform_indices = @transform_8, window_bounds = array<i64: 1, 8, 3>}, {transform_indices = @transform_9, window_bounds = array<i64: 1, 1, 15>}, {transform_indices = @transform_10, window_bounds = array<i64: 1, 32, 64>}, {transform_indices = @transform_11, window_bounds = array<i64: 1, 23, 32>}, {transform_indices = @transform_12, window_bounds = array<i64: 1, 1, 32>}, {transform_indices = @transform_13, window_bounds = array<i64: 1, 32, 32>}, {transform_indices = @transform_14, window_bounds = array<i64: 1, 1, 32>}, {transform_indices = @transform_15, window_bounds = array<i64: 1, 80, 32>}, {transform_indices = @transform_16, window_bounds = array<i64: 1, 1, 32>}, {transform_indices = @transform_17, window_bounds = array<i64: 1, 32, 32>}, {transform_indices = @transform_18, window_bounds = array<i64: 1, 1, 32>}, {transform_indices = @transform_19, window_bounds = array<i64: 1, 32, 32>}, {transform_indices = @transform_20, window_bounds = array<i64: 1, 1, 32>}, {transform_indices = @transform_21, window_bounds = array<i64: 1, 1, 32>}, {transform_indices = @transform_22, window_bounds = array<i64: 1, 1, 1>}, {transform_indices = @transform_23, window_bounds = array<i64: 1, 8, 128>}]} {
    %c0 = arith.constant 0 : index
    %c0_0 = arith.constant 0 : index
    %c0_1 = arith.constant 0 : index
    %0 = vector.load %arg1[%c0, %c0_0, %c0_1] : memref<1x8x3xf32, #tpu.memory_space<vmem>>, vector<1x8x3xf32>
    %1 = vector.shape_cast %0 : vector<1x8x3xf32> to vector<8x3xf32>
    %c0_2 = arith.constant 0 : index
    %c0_3 = arith.constant 0 : index
    %c0_4 = arith.constant 0 : index
    %2 = vector.load %arg2[%c0_2, %c0_3, %c0_4] : memref<1x8x32xf32, #tpu.memory_space<vmem>>, vector<1x8x32xf32>
    %3 = vector.shape_cast %2 : vector<1x8x32xf32> to vector<8x32xf32>
    %c0_5 = arith.constant 0 : index
    %c0_6 = arith.constant 0 : index
    %c0_7 = arith.constant 0 : index
    %4 = vector.load %arg7[%c0_5, %c0_6, %c0_7] : memref<1x8x1xf32, #tpu.memory_space<vmem>>, vector<1x8x1xf32>
    %5 = vector.shape_cast %4 : vector<1x8x1xf32> to vector<8x1xf32>
    %6 = arith.truncf %1 : vector<8x3xf32> to vector<8x3xbf16>
    %7 = arith.extf %6 : vector<8x3xbf16> to vector<8x3xf32>
    %8 = arith.subf %1, %7 : vector<8x3xf32>
    %9 = arith.truncf %8 : vector<8x3xf32> to vector<8x3xbf16>
    %10 = arith.truncf %3 : vector<8x32xf32> to vector<8x32xbf16>
    %c0_8 = arith.constant 0 : index
    %c0_9 = arith.constant 0 : index
    %c0_10 = arith.constant 0 : index
    %11 = vector.load %arg11[%c0_8, %c0_9, %c0_10] : memref<1x32x64xbf16, #tpu.memory_space<vmem>>, vector<1x32x64xbf16>
    %12 = vector.shape_cast %11 : vector<1x32x64xbf16> to vector<32x64xbf16>
    %cst = arith.constant dense<0.000000e+00> : vector<8x64xf32>
    %13 = tpu.matmul %10, %12, %cst {dimension_numbers = #tpu.dot_dimension_numbers<[1], [0], [0], [1], [0, 0, 1, 1], [], []>} : vector<8x32xbf16>, vector<32x64xbf16>, vector<8x64xf32> -> vector<8x64xf32>
    %14 = arith.truncf %13 : vector<8x64xf32> to vector<8x64xbf16>
    %15 = vector.extract_strided_slice %14 {offsets = [0, 0], sizes = [8, 32], strides = [1, 1]} : vector<8x64xbf16> to vector<8x32xbf16>
    %16 = tpu.concatenate %15, %6, %9 in 1 : vector<8x32xbf16>, vector<8x3xbf16>, vector<8x3xbf16> -> vector<8x38xbf16>
    %17 = vector.extract_strided_slice %14 {offsets = [0, 32], sizes = [8, 32], strides = [1, 1]} : vector<8x64xbf16> to vector<8x32xbf16>
    %18 = tpu.concatenate %17, %6, %9 in 1 : vector<8x32xbf16>, vector<8x3xbf16>, vector<8x3xbf16> -> vector<8x38xbf16>
    %c0_11 = arith.constant 0 : index
    %c0_12 = arith.constant 0 : index
    %c0_13 = arith.constant 0 : index
    %19 = vector.load %arg4[%c0_11, %c0_12, %c0_13] : memref<1x56x8xbf16, #tpu.memory_space<vmem>>, vector<1x56x8xbf16>
    %20 = vector.shape_cast %19 : vector<1x56x8xbf16> to vector<56x8xbf16>
    %cst_14 = arith.constant dense<0.000000e+00> : vector<56x38xf32>
    %21 = tpu.matmul %20, %16, %cst_14 {dimension_numbers = #tpu.dot_dimension_numbers<[1], [0], [0], [1], [0, 0, 1, 1], [], []>} : vector<56x8xbf16>, vector<8x38xbf16>, vector<56x38xf32> -> vector<56x38xf32>
    %c0_15 = arith.constant 0 : index
    %c0_16 = arith.constant 0 : index
    %c0_17 = arith.constant 0 : index
    %22 = vector.load %arg5[%c0_15, %c0_16, %c0_17] : memref<1x56x8xbf16, #tpu.memory_space<vmem>>, vector<1x56x8xbf16>
    %23 = vector.shape_cast %22 : vector<1x56x8xbf16> to vector<56x8xbf16>
    %cst_18 = arith.constant dense<0.000000e+00> : vector<56x38xf32>
    %24 = tpu.matmul %23, %18, %cst_18 {dimension_numbers = #tpu.dot_dimension_numbers<[1], [0], [0], [1], [0, 0, 1, 1], [], []>} : vector<56x8xbf16>, vector<8x38xbf16>, vector<56x38xf32> -> vector<56x38xf32>
    %25 = vector.extract_strided_slice %21 {offsets = [0, 0], sizes = [56, 32], strides = [1, 1]} : vector<56x38xf32> to vector<56x32xf32>
    %26 = vector.extract_strided_slice %24 {offsets = [0, 0], sizes = [56, 32], strides = [1, 1]} : vector<56x38xf32> to vector<56x32xf32>
    %27 = arith.addf %25, %26 : vector<56x32xf32>
    %28 = vector.extract_strided_slice %21 {offsets = [0, 32], sizes = [56, 3], strides = [1, 1]} : vector<56x38xf32> to vector<56x3xf32>
    %29 = vector.extract_strided_slice %21 {offsets = [0, 35], sizes = [56, 3], strides = [1, 1]} : vector<56x38xf32> to vector<56x3xf32>
    %30 = arith.addf %28, %29 : vector<56x3xf32>
    %31 = vector.extract_strided_slice %24 {offsets = [0, 32], sizes = [56, 3], strides = [1, 1]} : vector<56x38xf32> to vector<56x3xf32>
    %32 = vector.extract_strided_slice %24 {offsets = [0, 35], sizes = [56, 3], strides = [1, 1]} : vector<56x38xf32> to vector<56x3xf32>
    %33 = arith.addf %31, %32 : vector<56x3xf32>
    %34 = arith.subf %30, %33 : vector<56x3xf32>
    %35 = arith.mulf %34, %34 : vector<56x3xf32>
    %cst_19 = arith.constant dense<0.000000e+00> : vector<56xf32>
    %36 = vector.multi_reduction <add>, %35, %cst_19 [1] : vector<56x3xf32> to vector<56xf32>
    %37 = vector.shape_cast %36 : vector<56xf32> to vector<56x1xf32>
    %cst_20 = arith.constant 0.000000e+00 : f32
    %38 = vector.broadcast %cst_20 : f32 to vector<56x1xf32>
    %39 = arith.subf %38, %37 : vector<56x1xf32>
    %c0_21 = arith.constant 0 : index
    %c0_22 = arith.constant 0 : index
    %c0_23 = arith.constant 0 : index
    %40 = vector.load %arg10[%c0_21, %c0_22, %c0_23] : memref<1x1x15xf32, #tpu.memory_space<vmem>>, vector<1x1x15xf32>
    %41 = vector.shape_cast %40 : vector<1x1x15xf32> to vector<1x15xf32>
    %42 = vector.broadcast %39 : vector<56x1xf32> to vector<56x15xf32>
    %43 = vector.broadcast %41 : vector<1x15xf32> to vector<56x15xf32>
    %44 = arith.mulf %42, %43 : vector<56x15xf32>
    %45 = math.exp %44 : vector<56x15xf32>
    %c0_24 = arith.constant 0 : index
    %c0_25 = arith.constant 0 : index
    %c0_26 = arith.constant 0 : index
    %46 = vector.load %arg3[%c0_24, %c0_25, %c0_26] : memref<1x56x8xf32, #tpu.memory_space<vmem>>, vector<1x56x8xf32>
    %47 = vector.shape_cast %46 : vector<1x56x8xf32> to vector<56x8xf32>
    %48 = tpu.concatenate %47, %45 in 1 : vector<56x8xf32>, vector<56x15xf32> -> vector<56x23xf32>
    %49 = arith.truncf %48 : vector<56x23xf32> to vector<56x23xbf16>
    %c0_27 = arith.constant 0 : index
    %c0_28 = arith.constant 0 : index
    %c0_29 = arith.constant 0 : index
    %50 = vector.load %arg12[%c0_27, %c0_28, %c0_29] : memref<1x23x32xbf16, #tpu.memory_space<vmem>>, vector<1x23x32xbf16>
    %51 = vector.shape_cast %50 : vector<1x23x32xbf16> to vector<23x32xbf16>
    %cst_30 = arith.constant dense<0.000000e+00> : vector<56x32xf32>
    %52 = tpu.matmul %49, %51, %cst_30 {dimension_numbers = #tpu.dot_dimension_numbers<[1], [0], [0], [1], [0, 0, 1, 1], [], []>} : vector<56x23xbf16>, vector<23x32xbf16>, vector<56x32xf32> -> vector<56x32xf32>
    %53 = arith.addf %27, %52 : vector<56x32xf32>
    %c0_31 = arith.constant 0 : index
    %c0_32 = arith.constant 0 : index
    %c0_33 = arith.constant 0 : index
    %54 = vector.load %arg13[%c0_31, %c0_32, %c0_33] : memref<1x1x32xf32, #tpu.memory_space<vmem>>, vector<1x1x32xf32>
    %55 = vector.shape_cast %54 : vector<1x1x32xf32> to vector<1x32xf32>
    %56 = vector.broadcast %55 : vector<1x32xf32> to vector<56x32xf32>
    %57 = arith.addf %53, %56 : vector<56x32xf32>
    %cst_34 = arith.constant 0.000000e+00 : f32
    %58 = vector.broadcast %cst_34 : f32 to vector<56x32xf32>
    %59 = arith.cmpf oge, %57, %58 : vector<56x32xf32>
    %cst_35 = arith.constant 0.00999999977 : f32
    %60 = vector.broadcast %cst_35 : f32 to vector<56x32xf32>
    %61 = arith.mulf %60, %57 : vector<56x32xf32>
    %62 = arith.select %59, %57, %61 : vector<56x32xi1>, vector<56x32xf32>
    %63 = arith.truncf %62 : vector<56x32xf32> to vector<56x32xbf16>
    %c0_36 = arith.constant 0 : index
    %c0_37 = arith.constant 0 : index
    %c0_38 = arith.constant 0 : index
    %64 = vector.load %arg14[%c0_36, %c0_37, %c0_38] : memref<1x32x32xbf16, #tpu.memory_space<vmem>>, vector<1x32x32xbf16>
    %65 = vector.shape_cast %64 : vector<1x32x32xbf16> to vector<32x32xbf16>
    %cst_39 = arith.constant dense<0.000000e+00> : vector<56x32xf32>
    %66 = tpu.matmul %63, %65, %cst_39 {dimension_numbers = #tpu.dot_dimension_numbers<[1], [0], [0], [1], [0, 0, 1, 1], [], []>} : vector<56x32xbf16>, vector<32x32xbf16>, vector<56x32xf32> -> vector<56x32xf32>
    %c0_40 = arith.constant 0 : index
    %c0_41 = arith.constant 0 : index
    %c0_42 = arith.constant 0 : index
    %67 = vector.load %arg15[%c0_40, %c0_41, %c0_42] : memref<1x1x32xf32, #tpu.memory_space<vmem>>, vector<1x1x32xf32>
    %68 = vector.shape_cast %67 : vector<1x1x32xf32> to vector<1x32xf32>
    %69 = vector.broadcast %68 : vector<1x32xf32> to vector<56x32xf32>
    %70 = arith.addf %66, %69 : vector<56x32xf32>
    %71 = arith.truncf %70 : vector<56x32xf32> to vector<56x32xbf16>
    %c0_43 = arith.constant 0 : index
    %c0_44 = arith.constant 0 : index
    %c0_45 = arith.constant 0 : index
    %72 = vector.load %arg20[%c0_43, %c0_44, %c0_45] : memref<1x32x32xbf16, #tpu.memory_space<vmem>>, vector<1x32x32xbf16>
    %73 = vector.shape_cast %72 : vector<1x32x32xbf16> to vector<32x32xbf16>
    %cst_46 = arith.constant dense<0.000000e+00> : vector<56x32xf32>
    %74 = tpu.matmul %71, %73, %cst_46 {dimension_numbers = #tpu.dot_dimension_numbers<[1], [0], [0], [1], [0, 0, 1, 1], [], []>} : vector<56x32xbf16>, vector<32x32xbf16>, vector<56x32xf32> -> vector<56x32xf32>
    %c0_47 = arith.constant 0 : index
    %c0_48 = arith.constant 0 : index
    %c0_49 = arith.constant 0 : index
    %75 = vector.load %arg21[%c0_47, %c0_48, %c0_49] : memref<1x1x32xf32, #tpu.memory_space<vmem>>, vector<1x1x32xf32>
    %76 = vector.shape_cast %75 : vector<1x1x32xf32> to vector<1x32xf32>
    %77 = vector.broadcast %76 : vector<1x32xf32> to vector<56x32xf32>
    %78 = arith.addf %74, %77 : vector<56x32xf32>
    %cst_50 = arith.constant 0.000000e+00 : f32
    %79 = vector.broadcast %cst_50 : f32 to vector<56x32xf32>
    %80 = arith.cmpf oge, %78, %79 : vector<56x32xf32>
    %cst_51 = arith.constant 0.00999999977 : f32
    %81 = vector.broadcast %cst_51 : f32 to vector<56x32xf32>
    %82 = arith.mulf %81, %78 : vector<56x32xf32>
    %83 = arith.select %80, %78, %82 : vector<56x32xi1>, vector<56x32xf32>
    %c0_52 = arith.constant 0 : index
    %c0_53 = arith.constant 0 : index
    %c0_54 = arith.constant 0 : index
    %84 = vector.load %arg22[%c0_52, %c0_53, %c0_54] : memref<1x1x32xf32, #tpu.memory_space<vmem>>, vector<1x1x32xf32>
    %85 = vector.shape_cast %84 : vector<1x1x32xf32> to vector<1x32xf32>
    %86 = vector.broadcast %85 : vector<1x32xf32> to vector<56x32xf32>
    %87 = arith.mulf %83, %86 : vector<56x32xf32>
    %cst_55 = arith.constant dense<0.000000e+00> : vector<56xf32>
    %88 = vector.multi_reduction <add>, %87, %cst_55 [1] : vector<56x32xf32> to vector<56xf32>
    %89 = vector.shape_cast %88 : vector<56xf32> to vector<56x1xf32>
    %c0_56 = arith.constant 0 : index
    %c0_57 = arith.constant 0 : index
    %c0_58 = arith.constant 0 : index
    %90 = vector.load %arg23[%c0_56, %c0_57, %c0_58] : memref<1x1x1xf32, #tpu.memory_space<vmem>>, vector<1x1x1xf32>
    %91 = vector.shape_cast %90 : vector<1x1x1xf32> to vector<1x1xf32>
    %92 = vector.broadcast %91 : vector<1x1xf32> to vector<56x1xf32>
    %93 = arith.addf %89, %92 : vector<56x1xf32>
    %94 = vector.broadcast %93 : vector<56x1xf32> to vector<56x3xf32>
    %95 = arith.mulf %34, %94 : vector<56x3xf32>
    %96 = arith.truncf %95 : vector<56x3xf32> to vector<56x3xbf16>
    %97 = arith.extf %96 : vector<56x3xbf16> to vector<56x3xf32>
    %98 = arith.subf %95, %97 : vector<56x3xf32>
    %99 = arith.truncf %98 : vector<56x3xf32> to vector<56x3xbf16>
    %100 = tpu.concatenate %71, %96, %99 in 1 : vector<56x32xbf16>, vector<56x3xbf16>, vector<56x3xbf16> -> vector<56x38xbf16>
    %c0_59 = arith.constant 0 : index
    %c0_60 = arith.constant 0 : index
    %c0_61 = arith.constant 0 : index
    %101 = vector.load %arg6[%c0_59, %c0_60, %c0_61] : memref<1x8x56xbf16, #tpu.memory_space<vmem>>, vector<1x8x56xbf16>
    %102 = vector.shape_cast %101 : vector<1x8x56xbf16> to vector<8x56xbf16>
    %cst_62 = arith.constant dense<0.000000e+00> : vector<8x38xf32>
    %103 = tpu.matmul %102, %100, %cst_62 {dimension_numbers = #tpu.dot_dimension_numbers<[1], [0], [0], [1], [0, 0, 1, 1], [], []>} : vector<8x56xbf16>, vector<56x38xbf16>, vector<8x38xf32> -> vector<8x38xf32>
    %104 = vector.extract_strided_slice %103 {offsets = [0, 0], sizes = [8, 32], strides = [1, 1]} : vector<8x38xf32> to vector<8x32xf32>
    %105 = vector.broadcast %5 : vector<8x1xf32> to vector<8x32xf32>
    %106 = arith.mulf %104, %105 : vector<8x32xf32>
    %107 = vector.extract_strided_slice %103 {offsets = [0, 32], sizes = [8, 3], strides = [1, 1]} : vector<8x38xf32> to vector<8x3xf32>
    %108 = vector.extract_strided_slice %103 {offsets = [0, 35], sizes = [8, 3], strides = [1, 1]} : vector<8x38xf32> to vector<8x3xf32>
    %109 = arith.addf %107, %108 : vector<8x3xf32>
    %110 = vector.broadcast %5 : vector<8x1xf32> to vector<8x3xf32>
    %111 = arith.mulf %109, %110 : vector<8x3xf32>
    %c0_63 = arith.constant 0 : index
    %c0_64 = arith.constant 0 : index
    %c0_65 = arith.constant 0 : index
    %112 = vector.load %arg8[%c0_63, %c0_64, %c0_65] : memref<1x8x16xf32, #tpu.memory_space<vmem>>, vector<1x8x16xf32>
    %113 = vector.shape_cast %112 : vector<1x8x16xf32> to vector<8x16xf32>
    %114 = tpu.concatenate %3, %106, %113 in 1 : vector<8x32xf32>, vector<8x32xf32>, vector<8x16xf32> -> vector<8x80xf32>
    %115 = arith.truncf %114 : vector<8x80xf32> to vector<8x80xbf16>
    %c0_66 = arith.constant 0 : index
    %c0_67 = arith.constant 0 : index
    %c0_68 = arith.constant 0 : index
    %116 = vector.load %arg16[%c0_66, %c0_67, %c0_68] : memref<1x80x32xbf16, #tpu.memory_space<vmem>>, vector<1x80x32xbf16>
    %117 = vector.shape_cast %116 : vector<1x80x32xbf16> to vector<80x32xbf16>
    %cst_69 = arith.constant dense<0.000000e+00> : vector<8x32xf32>
    %118 = tpu.matmul %115, %117, %cst_69 {dimension_numbers = #tpu.dot_dimension_numbers<[1], [0], [0], [1], [0, 0, 1, 1], [], []>} : vector<8x80xbf16>, vector<80x32xbf16>, vector<8x32xf32> -> vector<8x32xf32>
    %c0_70 = arith.constant 0 : index
    %c0_71 = arith.constant 0 : index
    %c0_72 = arith.constant 0 : index
    %119 = vector.load %arg17[%c0_70, %c0_71, %c0_72] : memref<1x1x32xf32, #tpu.memory_space<vmem>>, vector<1x1x32xf32>
    %120 = vector.shape_cast %119 : vector<1x1x32xf32> to vector<1x32xf32>
    %121 = vector.broadcast %120 : vector<1x32xf32> to vector<8x32xf32>
    %122 = arith.addf %118, %121 : vector<8x32xf32>
    %cst_73 = arith.constant 0.000000e+00 : f32
    %123 = vector.broadcast %cst_73 : f32 to vector<8x32xf32>
    %124 = arith.cmpf oge, %122, %123 : vector<8x32xf32>
    %cst_74 = arith.constant 0.00999999977 : f32
    %125 = vector.broadcast %cst_74 : f32 to vector<8x32xf32>
    %126 = arith.mulf %125, %122 : vector<8x32xf32>
    %127 = arith.select %124, %122, %126 : vector<8x32xi1>, vector<8x32xf32>
    %128 = arith.truncf %127 : vector<8x32xf32> to vector<8x32xbf16>
    %c0_75 = arith.constant 0 : index
    %c0_76 = arith.constant 0 : index
    %c0_77 = arith.constant 0 : index
    %129 = vector.load %arg18[%c0_75, %c0_76, %c0_77] : memref<1x32x32xbf16, #tpu.memory_space<vmem>>, vector<1x32x32xbf16>
    %130 = vector.shape_cast %129 : vector<1x32x32xbf16> to vector<32x32xbf16>
    %cst_78 = arith.constant dense<0.000000e+00> : vector<8x32xf32>
    %131 = tpu.matmul %128, %130, %cst_78 {dimension_numbers = #tpu.dot_dimension_numbers<[1], [0], [0], [1], [0, 0, 1, 1], [], []>} : vector<8x32xbf16>, vector<32x32xbf16>, vector<8x32xf32> -> vector<8x32xf32>
    %c0_79 = arith.constant 0 : index
    %c0_80 = arith.constant 0 : index
    %c0_81 = arith.constant 0 : index
    %132 = vector.load %arg19[%c0_79, %c0_80, %c0_81] : memref<1x1x32xf32, #tpu.memory_space<vmem>>, vector<1x1x32xf32>
    %133 = vector.shape_cast %132 : vector<1x1x32xf32> to vector<1x32xf32>
    %134 = vector.broadcast %133 : vector<1x32xf32> to vector<8x32xf32>
    %135 = arith.addf %131, %134 : vector<8x32xf32>
    %cst_82 = arith.constant 5.000000e-01 : f32
    %136 = vector.broadcast %cst_82 : f32 to vector<8x32xf32>
    %137 = arith.mulf %136, %135 : vector<8x32xf32>
    %cst_83 = arith.constant 5.000000e-01 : f32
    %138 = vector.broadcast %cst_83 : f32 to vector<8x32xf32>
    %139 = arith.mulf %138, %3 : vector<8x32xf32>
    %140 = arith.addf %137, %139 : vector<8x32xf32>
    %c0_84 = arith.constant 0 : index
    %c0_85 = arith.constant 0 : index
    %c0_86 = arith.constant 0 : index
    %141 = vector.load %arg9[%c0_84, %c0_85, %c0_86] : memref<1x8x3xf32, #tpu.memory_space<vmem>>, vector<1x8x3xf32>
    %142 = vector.shape_cast %141 : vector<1x8x3xf32> to vector<8x3xf32>
    %cst_87 = arith.constant 2.500000e-01 : f32
    %143 = vector.broadcast %cst_87 : f32 to vector<8x3xf32>
    %144 = arith.mulf %143, %142 : vector<8x3xf32>
    %cst_88 = arith.constant 7.500000e-01 : f32
    %145 = vector.broadcast %cst_88 : f32 to vector<8x3xf32>
    %146 = arith.mulf %145, %1 : vector<8x3xf32>
    %147 = arith.addf %144, %146 : vector<8x3xf32>
    %148 = arith.addf %147, %111 : vector<8x3xf32>
    %c1_i32 = arith.constant 1 : i32
    %149 = arith.cmpi eq, %arg0, %c1_i32 : i32
    %150 = arith.extui %149 : i1 to i32
    %151 = arith.sitofp %150 : i32 to f32
    %152 = vector.broadcast %151 : f32 to vector<8x3xf32>
    %153 = arith.mulf %152, %148 : vector<8x3xf32>
    %cst_89 = arith.constant 1.000000e+00 : f32
    %154 = arith.subf %cst_89, %151 : f32
    %155 = vector.broadcast %154 : f32 to vector<8x3xf32>
    %156 = arith.mulf %155, %1 : vector<8x3xf32>
    %157 = arith.addf %153, %156 : vector<8x3xf32>
    %cst_90 = arith.constant 0.000000e+00 : f32
    %158 = vector.broadcast %cst_90 : f32 to vector<8x93xf32>
    %159 = tpu.concatenate %140, %157, %158 in 1 : vector<8x32xf32>, vector<8x3xf32>, vector<8x93xf32> -> vector<8x128xf32>
    %c0_91 = arith.constant 0 : index
    %c0_92 = arith.constant 0 : index
    %c0_93 = arith.constant 0 : index
    %160 = vector.load %arg24[%c0_91, %c0_92, %c0_93] : memref<1x8x128xf32, #tpu.memory_space<vmem>>, vector<1x8x128xf32>
    %161 = vector.shape_cast %160 : vector<1x8x128xf32> to vector<8x128xf32>
    %162 = vector.shape_cast %159 : vector<8x128xf32> to vector<1x8x128xf32>
    tpu.vector_store %arg24[%c0_91, %c0_92, %c0_93], %162 {strides = array<i32>} : memref<1x8x128xf32, #tpu.memory_space<vmem>>, vector<1x8x128xf32>,
    return
  }
  func.func @transform_0(%arg0: i32) -> (i32, i32, i32) {
    %c0_i32 = arith.constant 0 : i32
    %c0_i32_0 = arith.constant 0 : i32
    %c0_i32_1 = arith.constant 0 : i32
    return %arg0, %c0_i32, %c0_i32_0 : i32, i32, i32
  }
  func.func @transform_1(%arg0: i32) -> (i32, i32, i32) {
    %c0_i32 = arith.constant 0 : i32
    %c0_i32_0 = arith.constant 0 : i32
    %c0_i32_1 = arith.constant 0 : i32
    return %arg0, %c0_i32, %c0_i32_0 : i32, i32, i32
  }
  func.func @transform_2(%arg0: i32) -> (i32, i32, i32) {
    %c0_i32 = arith.constant 0 : i32
    %c0_i32_0 = arith.constant 0 : i32
    %c0_i32_1 = arith.constant 0 : i32
    return %arg0, %c0_i32, %c0_i32_0 : i32, i32, i32
  }
  func.func @transform_3(%arg0: i32) -> (i32, i32, i32) {
    %c0_i32 = arith.constant 0 : i32
    %c0_i32_0 = arith.constant 0 : i32
    %c0_i32_1 = arith.constant 0 : i32
    return %arg0, %c0_i32, %c0_i32_0 : i32, i32, i32
  }
  func.func @transform_4(%arg0: i32) -> (i32, i32, i32) {
    %c0_i32 = arith.constant 0 : i32
    %c0_i32_0 = arith.constant 0 : i32
    %c0_i32_1 = arith.constant 0 : i32
    return %arg0, %c0_i32, %c0_i32_0 : i32, i32, i32
  }
  func.func @transform_5(%arg0: i32) -> (i32, i32, i32) {
    %c0_i32 = arith.constant 0 : i32
    %c0_i32_0 = arith.constant 0 : i32
    %c0_i32_1 = arith.constant 0 : i32
    return %arg0, %c0_i32, %c0_i32_0 : i32, i32, i32
  }
  func.func @transform_6(%arg0: i32) -> (i32, i32, i32) {
    %c0_i32 = arith.constant 0 : i32
    %c0_i32_0 = arith.constant 0 : i32
    %c0_i32_1 = arith.constant 0 : i32
    return %arg0, %c0_i32, %c0_i32_0 : i32, i32, i32
  }
  func.func @transform_7(%arg0: i32) -> (i32, i32, i32) {
    %c0_i32 = arith.constant 0 : i32
    %c0_i32_0 = arith.constant 0 : i32
    %c0_i32_1 = arith.constant 0 : i32
    return %arg0, %c0_i32, %c0_i32_0 : i32, i32, i32
  }
  func.func @transform_8(%arg0: i32) -> (i32, i32, i32) {
    %c0_i32 = arith.constant 0 : i32
    %c0_i32_0 = arith.constant 0 : i32
    %c0_i32_1 = arith.constant 0 : i32
    return %arg0, %c0_i32, %c0_i32_0 : i32, i32, i32
  }
  func.func @transform_9(%arg0: i32) -> (i32, i32, i32) {
    %c0_i32 = arith.constant 0 : i32
    %c0_i32_0 = arith.constant 0 : i32
    %c0_i32_1 = arith.constant 0 : i32
    return %arg0, %c0_i32, %c0_i32_0 : i32, i32, i32
  }
  func.func @transform_10(%arg0: i32) -> (i32, i32, i32) {
    %c0_i32 = arith.constant 0 : i32
    %c0_i32_0 = arith.constant 0 : i32
    %c0_i32_1 = arith.constant 0 : i32
    return %arg0, %c0_i32, %c0_i32_0 : i32, i32, i32
  }
  func.func @transform_11(%arg0: i32) -> (i32, i32, i32) {
    %c0_i32 = arith.constant 0 : i32
    %c0_i32_0 = arith.constant 0 : i32
    %c0_i32_1 = arith.constant 0 : i32
    return %arg0, %c0_i32, %c0_i32_0 : i32, i32, i32
  }
  func.func @transform_12(%arg0: i32) -> (i32, i32, i32) {
    %c0_i32 = arith.constant 0 : i32
    %c0_i32_0 = arith.constant 0 : i32
    %c0_i32_1 = arith.constant 0 : i32
    return %arg0, %c0_i32, %c0_i32_0 : i32, i32, i32
  }
  func.func @transform_13(%arg0: i32) -> (i32, i32, i32) {
    %c0_i32 = arith.constant 0 : i32
    %c0_i32_0 = arith.constant 0 : i32
    %c0_i32_1 = arith.constant 0 : i32
    return %arg0, %c0_i32, %c0_i32_0 : i32, i32, i32
  }
  func.func @transform_14(%arg0: i32) -> (i32, i32, i32) {
    %c0_i32 = arith.constant 0 : i32
    %c0_i32_0 = arith.constant 0 : i32
    %c0_i32_1 = arith.constant 0 : i32
    return %arg0, %c0_i32, %c0_i32_0 : i32, i32, i32
  }
  func.func @transform_15(%arg0: i32) -> (i32, i32, i32) {
    %c0_i32 = arith.constant 0 : i32
    %c0_i32_0 = arith.constant 0 : i32
    %c0_i32_1 = arith.constant 0 : i32
    return %arg0, %c0_i32, %c0_i32_0 : i32, i32, i32
  }
  func.func @transform_16(%arg0: i32) -> (i32, i32, i32) {
    %c0_i32 = arith.constant 0 : i32
    %c0_i32_0 = arith.constant 0 : i32
    %c0_i32_1 = arith.constant 0 : i32
    return %arg0, %c0_i32, %c0_i32_0 : i32, i32, i32
  }
  func.func @transform_17(%arg0: i32) -> (i32, i32, i32) {
    %c0_i32 = arith.constant 0 : i32
    %c0_i32_0 = arith.constant 0 : i32
    %c0_i32_1 = arith.constant 0 : i32
    return %arg0, %c0_i32, %c0_i32_0 : i32, i32, i32
  }
  func.func @transform_18(%arg0: i32) -> (i32, i32, i32) {
    %c0_i32 = arith.constant 0 : i32
    %c0_i32_0 = arith.constant 0 : i32
    %c0_i32_1 = arith.constant 0 : i32
    return %arg0, %c0_i32, %c0_i32_0 : i32, i32, i32
  }
  func.func @transform_19(%arg0: i32) -> (i32, i32, i32) {
    %c0_i32 = arith.constant 0 : i32
    %c0_i32_0 = arith.constant 0 : i32
    %c0_i32_1 = arith.constant 0 : i32
    return %arg0, %c0_i32, %c0_i32_0 : i32, i32, i32
  }
  func.func @transform_20(%arg0: i32) -> (i32, i32, i32) {
    %c0_i32 = arith.constant 0 : i32
    %c0_i32_0 = arith.constant 0 : i32
    %c0_i32_1 = arith.constant 0 : i32
    return %arg0, %c0_i32, %c0_i32_0 : i32, i32, i32
  }
  func.func @transform_21(%arg0: i32) -> (i32, i32, i32) {
    %c0_i32 = arith.constant 0 : i32
    %c0_i32_0 = arith.constant 0 : i32
    %c0_i32_1 = arith.constant 0 : i32
    return %arg0, %c0_i32, %c0_i32_0 : i32, i32, i32
  }
  func.func @transform_22(%arg0: i32) -> (i32, i32, i32) {
    %c0_i32 = arith.constant 0 : i32
    %c0_i32_0 = arith.constant 0 : i32
    %c0_i32_1 = arith.constant 0 : i32
    return %arg0, %c0_i32, %c0_i32_0 : i32, i32, i32
  }
  func.func @transform_23(%arg0: i32) -> (i32, i32, i32) {
    %c0_i32 = arith.constant 0 : i32
    %c0_i32_0 = arith.constant 0 : i32
    %c0_i32_1 = arith.constant 0 : i32
    return %arg0, %c0_i32, %c0_i32_0 : i32, i32, i32
  }
}

</mosaic_0001>

<bundles_post_ra>
// kernel: tpu_custom_call.1
= control target key start
LH: loop header
LB: loop body
LE: loop exit
PB: predicated region body
PF: predicated region fallthrough
CT: control target
= control target key end

     0   :  { %s3351_s0 = inlined_call_operand.vmem [shape: f32[2,8,3], index: 0, kind: input, shape index: {}]   ;;  %s3352_s1 = inlined_call_operand.vmem [shape: f32[2,8,32], index: 1, kind: input, shape index: {}]   ;;  %s3353_s2 = inlined_call_operand.vmem [shape: f32[2,56,8], index: 2, kind: input, shape index: {}]   ;;  %s3354_s3 = inlined_call_operand.vmem [shape: bf16[2,56,8], index: 3, kind: input, shape index: {}]   ;;  %s3355_s4 = inlined_call_operand.vmem [shape: bf16[2,56,8], index: 4, kind: input, shape index: {}]   ;;  %s3356_s5 = inlined_call_operand.vmem [shape: bf16[2,8,56], index: 5, kind: input, shape index: {}]   ;;  %s3357_s6 = inlined_call_operand.vmem [shape: f32[2,8,1], index: 6, kind: input, shape index: {}]   ;;  %s3358_s7 = inlined_call_operand.vmem [shape: f32[2,8,16], index: 7, kind: input, shape index: {}]   ;;  %s3359_s8 = inlined_call_operand.vmem [shape: f32[2,8,3], index: 8, kind: input, shape index: {}]   ;;  %s3360_s9 = inlined_call_operand.vmem [shape: f32[2,1,15], index: 9, kind: input, shape index: {}]   ;;  %s3361_s10 = inlined_call_operand.vmem [shape: bf16[2,32,64], index: 10, kind: input, shape index: {}]   ;;  %s3362_s11 = inlined_call_operand.vmem [shape: bf16[2,23,32], index: 11, kind: input, shape index: {}]   ;;  %s3363_s12 = inlined_call_operand.vmem [shape: f32[2,1,32], index: 12, kind: input, shape index: {}]   ;;  %s3364_s13 = inlined_call_operand.vmem [shape: bf16[2,32,32], index: 13, kind: input, shape index: {}]   ;;  %s3365_s14 = inlined_call_operand.vmem [shape: f32[2,1,32], index: 14, kind: input, shape index: {}]   ;;  %s3366_s15 = inlined_call_operand.vmem [shape: bf16[2,80,32], index: 15, kind: input, shape index: {}]   ;;  %s3367_s16 = inlined_call_operand.vmem [shape: f32[2,1,32], index: 16, kind: input, shape index: {}]   ;;  %s3368_s17 = inlined_call_operand.vmem [shape: bf16[2,32,32], index: 17, kind: input, shape index: {}]   ;;  %s3369_s18 = inlined_call_operand.vmem [shape: f32[2,1,32], index: 18, kind: input, shape index: {}]   ;;  %s3370_s19 = inlined_call_operand.vmem [shape: bf16[2,32,32], index: 19, kind: input, shape index: {}]   ;;  %s3371_s20 = inlined_call_operand.vmem [shape: f32[2,1,32], index: 20, kind: input, shape index: {}]   ;;  %s3372_s21 = inlined_call_operand.vmem [shape: f32[2,1,32], index: 21, kind: input, shape index: {}]   ;;  %s3373_s22 = inlined_call_operand.vmem [shape: f32[2,1,1], index: 22, kind: input, shape index: {}]   ;;  %s3374_s23 = inlined_call_operand.hbm [shape: f32[2,8,128], index: 23, kind: output, shape index: {}]  }
   0x1   :  { %3388 = sst [smem:[#allocation12_spill]] %s3351_s0 }
   0x2   :  { %3389 = sst [smem:[#allocation13_spill]] %s3352_s1 }
   0x3   :  { %3390 = sst [smem:[#allocation14_spill]] %s3353_s2 }
   0x4   :  { %3391 = sst [smem:[#allocation15_spill]] %s3354_s3 }
   0x5   :  { %3392 = sst [smem:[#allocation16_spill]] %s3355_s4 }
   0x6   :  { %3393 = sst [smem:[#allocation17_spill]] %s3356_s5 }
   0x7   :  { %3394 = sst [smem:[#allocation18_spill]] %s3357_s6 }
   0x8   :  { %3395 = sst [smem:[#allocation19_spill]] %s3358_s7 }
   0x9   :  { %3396 = sst [smem:[#allocation20_spill]] %s3360_s9 }
   0xa   :  { %3397 = sst [smem:[#allocation21_spill]] %s3361_s10 }
   0xb   :  { %3398 = sst [smem:[#allocation22_spill]] %s3374_s23 }
   0xc   :  { %28 = vsyncpa [#allocation3], 0 }
   0xd   :  { %30 = vsyncpa [#allocation3 + $0x1], 0  ;;  %s2882_s4 = smov 0   ;;  %s2884_s30 = smov 0  }
   0xe   :  { %s2886_s24 = smov 0   ;;  %s2888_s25 = smov 0  }
   0xf LB: > { %3399 = sst [smem:[#allocation5_spill]] %s2739_s4  ;;  %s2903_s5 = sadd.s32 4294967295, %s2751_s25   ;;  %s2751_s25 = sphi %s2888_s25, %s3426_s25   ;;  %s2747_s24 = sphi %s2886_s24, %s3428_s24   ;;  %s2743_s30 = sphi %s2884_s30, %s3430_s30   ;;  %s2739_s4 = sphi %s2882_s4, %s3429_s4  }
  0x10   : > { %3400 = sst [smem:[#allocation6_spill]] %s2747_s24  ;;  %s2438_s1 = sadd.s32 4294967294, %s2751_s25  }
  0x11   : > { %3401 = sst [smem:[#allocation7_spill]] %s2751_s25  ;;  %s2907_s26 = sadd.s32 1, %s2751_s25  }
  0x12   : > { %3402 = sst [smem:[#allocation8_spill]] %s2907_s26  ;;  %s641_s2 = sadd.s32 1, %s2747_s24 }
  0x13   : > { %s638_s6 = ssub.s32 %s2751_s25, %s2907_s26  ;;  %p651_p0 = scmp.ne.s32.totalorder %s2747_s24, %s2743_s30 }
  0x14   : > { %p639_p1 = scmp.eq.s32.totalorder %s638_s6, 0  ;;  %p652_p2 = scmp.eq.s32.totalorder %s2903_s5, 1 }
  0x15   : > { %p657_p3 = scmp.ne.s32.totalorder %s2743_s30, %s2739_s4  ;;  %p658_p4 = scmp.eq.s32.totalorder %s2438_s1, 1 }
  0x16   : > { %s2918_s27 = scalar_select %p639_p1, %s2747_s24, %s641_s2  }
  0x17   : > { %p2922_p5 = por %p652_p2, %p651_p0  ;;  %p2926_p6 = por %p658_p4, %p657_p3 }
  0x18   : > { %3403 = sst [smem:[#allocation9_spill]] %s2918_s27  ;;  %p2441_p7 = scmp.ge.s32.totalorder %s2751_s25, 1 }
  0x19   : > { %s3404_s7 = scalar_select %p2922_p5, 1, 0 }
  0x1a   : > { %s3406_s28 = scalar_select %p2926_p6, 1, 0 }
  0x1b   : > { %3405 = sst [smem:[#allocation10_spill]] %s3404_s7  ;;  %p838_p8 = scmp.lt.s32.totalorder %s2751_s25, 3 }
  0x1c   : > { %3407 = sst [smem:[#allocation11_spill]] %s3406_s28 }
  0x1d   : > { %p839_p9 = pnand %p2441_p7, %p838_p8 }
  0x1e   : > { %p990_p10 = scmp.lt.s32.totalorder (!%p839_p9), %s2903_s5, 1  ;;  %s3408_s10 = sld [smem:[#allocation21_spill]] (!%p839_p9) }
  0x1f   : > { %842 = sbr.rel (%p839_p9) target bundleno = 2389 (0x955), region = 112  ;;  %s3409_s26 = sld [smem:[#allocation13_spill]] (!%p839_p9) }
  0x20   : > { %s3410_s7 = sld [smem:[#allocation12_spill]] (!%p839_p9)  ;;  %s3385_s24 = smov (!%p839_p9), 32  }
  0x21   : > { %s2754_s4 = smov (!%p839_p9), 35   ;;  %s3384_s2 = smov (!%p839_p9), 96  }
  0x22   : > { %s3413_s9 = sld [smem:[#allocation20_spill]] (!%p839_p9) }
  0x24   : > { %s2934_s29 = scalar_select %p990_p10, %s2903_s5, 1  ;;  %vm1108_vm0 = vcmask 261120   ;;  %vm1139_vm1 = vcmask 285696   ;;  %vm1188_vm2 = vcmask 1043456   ;;  %vm1175_vm3 = vcmask 64512  }
  0x25   : > { %vm1405_vm4 = vcmask 23552   ;;  %vm1530_vm5 = vcmask 1042432   ;;  %vm1517_vm6 = vcmask 187392  }
  0x26   : > { %s2937_s3 = sshll.u32 %s2934_s29, 4  ;;  %s2940_s0 = sshll.u32 %s2934_s29, 3 }
  0x27   : > { %s1036_s6 = scalar_lea.vmem %s3408_s10, %s2937_s3  ;;  %s2950_s28 = scalar_lea.vmem %s3409_s26, %s2940_s0 }
  0x28   : > { %v2575_v0 = vld [vmem:[%s1036_s6 + $0x8] sm:$0xff]  ;;  %s2956_s23 = scalar_lea.vmem %s3410_s7, %s2940_s0  ;;  %v2574_v2 = vld [vmem:[%s1036_s6] sm:$0xff]  ;;  %s2596_s25 = smul.u32 28, %s2934_s29 }
  0x29   : > { %v1084_v1 = vld [vmem:[%s2956_s23] sm:$0xff]  ;;  %1118 = vmatpush.bf16.msra.mxu0 %v2575_v0  ;;  %s3411_s7 = sld [smem:[#allocation15_spill]]  ;;  %s1031_s6 = scalar_lea.vmem %s3413_s9, %s2934_s29 }
  0x2a   : > { %v1085_v3 = vld [vmem:[%s2950_s28] sm:$0xff]  ;;  %v1087_v4 = vpack.c.bf16 %v1084_v1, %v1084_v1  ;;  %s3412_s26 = sld [smem:[#allocation16_spill]] }
  0x2b   : > { %v1091_v7 = vpack.c.bf16 %v1085_v3, %v1085_v3 }
  0x2c   : > { %v1127_v5 = vunpack.c.l.b16 %v1087_v4  ;;  %v1088_v6 = vunpack.c.l.bf16 %v1087_v4 }
  0x2d   : > { %1119 = vmatpush.bf16.msra.mxu0 %v2574_v2 }
  0x2e   : > { %v1128_v8 = vpack.c.b16 %v1127_v5, %v1127_v5  ;;  %v1089_v9 = vsub.f32 %v1084_v1, %v1088_v6 }
  0x2f   : > { %s2966_s1 = scalar_lea.vmem %s3411_s7, %s2596_s25  ;;  %s3387_s7 = smov 125  }
  0x30   : > { %1129 = vrot.lane.b32.xlu0 %v1128_v8, %s3385_s24  ;;  %v1090_v10 = vpack.c.bf16 %v1089_v9, %v1089_v9  ;;  %2470 = vmatmul.msk.bf16.vlgmr.msra.gmra.mxu0 %vm1108_vm0, %v1091_v7  ;;  %v2576_v22 = vld [vmem:[%s2966_s1] sm:$0xff]  ;;  %v2577_v23 = vld [vmem:[%s2966_s1 + $0x8] sm:$0xff]  ;;  %v2578_v25 = vld [vmem:[%s2966_s1 + $0x10] sm:$0xff]  ;;  %s1012_s27 = scalar_lea.vmem %s3412_s26, %s2596_s25  ;;  %s2757_s26 = smov 8  }
  0x31   : > { %v2579_v30 = vld [vmem:[%s1012_s27] sm:$0xff]  ;;  %v2580_v32 = vld [vmem:[%s1012_s27 + $0x8] sm:$0xff]  ;;  %v2581_v35 = vld [vmem:[%s1012_s27 + $0x10] sm:$0xff]  ;;  %s2595_s25 = smul.u32 56, %s2934_s29  ;;  %s1073_s24 = scalar_lea.vmem %s3370_s19, %s2937_s3 }
  0x32   : > { %v1132_v11 = vunpack.c.l.b16 %v1090_v10  ;;  %v1225_v36 = vld [vmem:[%s1012_s27 + $0x18] sm:$0xf]  ;;  %s1044_s27 = scalar_lea.vmem %s3363_s12, %s2934_s29 }
  0x33   : > { %v1239_v37 = vunpack.c.l.b16 %v1225_v36  ;;  %v1156_v39 = vld [vmem:[%s2966_s1 + $0x18] sm:$0xf] }
  0x34   : > { %v1133_v12 = vpack.c.b16 %v1132_v11, %v1132_v11  ;;  %v1170_v40 = vunpack.c.l.b16 %v1156_v39 }
  0x35   : > { %v1243_v38 = vpack.c.b16 %v1239_v37, %v1239_v37 }
  0x36   : > { %1134 = vrot.lane.b32.xlu1 %v1133_v12, %s2754_s4  ;;  %v1174_v41 = vpack.c.b16 %v1170_v40, %v1170_v40  ;;  %s2597_s4 = smul.u32 12, %s2934_s29 }
  0x38   : > { %s3114_s1 = scalar_lea.vmem %s3362_s11, %s2597_s4  ;;  %s1052_s4 = scalar_lea.vmem %s3365_s14, %s2934_s29 }
  0xa2   : > { %v1130_v14 = vpop.permute.xlu0 %1129 }
  0xa8   : > { %v1135_v16 = vpop.permute.xlu1 %1134 }
  0xad   : > { %v1121_v13 = vpop.f32.mrf.mxu0 }
  0xae   : > { %v1125_v15 = vpack.c.bf16 %v1121_v13, %v1121_v13 }
  0xb0   : > { %v1143_v17 = vunpack.c.l.b16 %v1125_v15  ;;  %v1138_v18 = vsel %vm1108_vm0, %v1125_v15, %v1130_v14 }
  0xb1   : > { %v1141_v19 = vsel %vm1139_vm1, %v1138_v18, %v1135_v16 }
  0xb2   : > { %v1144_v20 = vpack.c.b16 %v1143_v17, %v1143_v17  ;;  %v1189_v21 = vsel %vm1188_vm2, %v1141_v19, 0 }
  0xb3   : > { %1198 = vmatpush.bf16.msrb.mxu0 %v1189_v21  ;;  %2594 = vmatpush.bf16.msra.mxu1 %v1189_v21 }
  0xb4   : > { %1145 = vrot.lane.b32.xlu0 %v1144_v20, %s3384_s2 }
  0xb5   : > { %v1123_v24 = vpop.f32.mrf.mxu0 }
  0xb6   : > { %2483 = vmatmul.msk.bf16.vlgmr.msrb.gmra.mxu0 %vm1175_vm3, %v2576_v22  ;;  %2484 = vmatmul.msk.bf16.vlgmr.msra.gmra.mxu1 %vm1175_vm3, %v2577_v23 }
  0xc6   : > { %2485 = vmatmul.msk.bf16.gmra.mxu1 %vm1175_vm3, %v2578_v25 }
  0xd6   : > { %2486 = vmatmul.msk.bf16.gmra.mxu1 %vm1175_vm3, %v1174_v41 }
 0x126   : > { %v1146_v26 = vpop.permute.xlu0 %1145 }
 0x127   : > { %v1148_v27 = vsel %vm1108_vm0, %v1146_v26, %v1130_v14 }
 0x128   : > { %v1149_v28 = vsel %vm1139_vm1, %v1148_v27, %v1135_v16 }
 0x129   : > { %v1256_v29 = vsel %vm1188_vm2, %v1149_v28, 0 }
 0x12a   : > { %1265 = vmatpush.bf16.msra.mxu2 %v1256_v29 }
 0x12d   : > { %2499 = vmatmul.msk.bf16.vlgmr.msra.gmra.mxu2 %vm1175_vm3, %v2579_v30 }
 0x133   : > { %v2985_v31 = vpop.f32.mrf.mxu0  ;;  %v2989_v33 = vpop.f32.mrf.mxu1 }
 0x134   : > { %1300 = vrot.lane.b32.xlu1 %v2985_v31, %s3387_s7 }
 0x13b   : > { %v2991_v34 = vpop.f32.mrf.mxu0  ;;  %v3006_v43 = vpop.f32.mrf.mxu1 }
 0x13c   : > { %1304 = vrot.lane.b32.xlu1 %v2989_v33, %s3387_s7  ;;  %1302 = vrot.lane.b32.xlu2 %v2991_v34, %s3387_s7 }
 0x13d   : > { %2500 = vmatmul.msk.bf16.gmra.mxu2 %vm1175_vm3, %v2580_v32 }
 0x143   : > { %v3014_v45 = vpop.f32.mrf.mxu1 }
 0x14b   : > { %v3022_v47 = vpop.f32.mrf.mxu1 }
 0x14d   : > { %2501 = vmatmul.msk.bf16.gmra.mxu2 %vm1175_vm3, %v2581_v35 }
 0x153   : > { %v3049_v60 = vpop.f32.mrf.mxu1 }
 0x15b   : > { %v1217_v61 = vpop.f32.mrf.mxu1 }
 0x15c   : > { %v3105_v61 = vld [vmem:[%s1031_s6] ss:$0 sm:$0xff]  ;;  %s2598_s6 = smul.u32 40, %s2934_s29 }
 0x15d   : > { %2502 = vmatmul.msk.bf16.gmra.mxu2 %vm1175_vm3, %v1243_v38 }
 0x15e   : > { %s1057_s10 = scalar_lea.vmem %s3366_s15, %s2598_s6  ;;  %s1028_s6 = scalar_lea.vmem %s3359_s8, %s2940_s0 }
 0x196   : > { %v1303_v53 = vpop.permute.xlu2 %1302 }
 0x197   : > { %v1322_v0 = vadd.f32 %v1303_v53, %v2991_v34 }
 0x1a6   : > { %v1301_v54 = vpop.permute.xlu1 %1300 }
 0x1a7   : > { %v1321_v56 = vadd.f32 %v1301_v54, %v2985_v31 }
 0x1ae   : > { %v1305_v4 = vpop.permute.xlu1 %1304 }
 0x1af   : > { %v1323_v7 = vadd.f32 %v1305_v4, %v2989_v33 }
 0x1b0   : > { %v3002_v42 = vpop.f32.mrf.mxu2 }
 0x1b1   : > { %1335 = vrot.lane.b32.xlu2 %v3002_v42, %s3387_s7 }
 0x1b8   : > { %v3008_v44 = vpop.f32.mrf.mxu2 }
 0x1b9   : > { %1337 = vrot.lane.b32.xlu0 %v3008_v44, %s3387_s7  ;;  %1306 = vrot.lane.b32.xlu2 %v3006_v43, %s3387_s7 }
 0x1c0   : > { %v3016_v46 = vpop.f32.mrf.mxu2 }
 0x1c1   : > { %1339 = vrot.lane.b32.xlu0 %v3016_v46, %s3387_s7  ;;  %1308 = vrot.lane.b32.xlu2 %v3014_v45, %s3387_s7 }
 0x1c8   : > { %v3024_v48 = vpop.f32.mrf.mxu2 }
 0x1c9   : > { %1310 = vrot.lane.b32.xlu0 %v3022_v47, %s3387_s7  ;;  %1341 = vrot.lane.b32.xlu1 %v3024_v48, %s3387_s7 }
 0x1d0   : > { %v3030_v49 = vpop.f32.mrf.mxu2 }
 0x1d1   : > { %1343 = vrot.lane.b32.xlu1 %v3030_v49, %s3387_s7 }
 0x1d8   : > { %v3034_v50 = vpop.f32.mrf.mxu2 }
 0x1d9   : > { %1345 = vrot.lane.b32.xlu2 %v3034_v50, %s3387_s7 }
 0x1e0   : > { %v3038_v51 = vpop.f32.mrf.mxu2 }
 0x1e1   : > { %1347 = vrot.lane.b32.xlu2 %v3038_v51, %s3387_s7 }
 0x1e8   : > { %v1284_v52 = vpop.f32.mrf.mxu2 }
 0x20b   : > { %v1336_v55 = vpop.permute.xlu2 %1335 }
 0x20c   : > { %v1356_v57 = vadd.f32 %v1336_v55, %v3002_v42 }
 0x20e   : > { %v3044_v58 = vsub.f32 %v1321_v56, %v1356_v57 }
 0x210   : > { %v1370_v59 = vmul.f32 %v3044_v58, %v3044_v58 }
 0x212   : > { %1384 = vrot.lane.b32.xlu0 %v1370_v59, %s3384_s2 }
 0x213   : > { %v1307_v62 = vpop.permute.xlu2 %1306 }
 0x214   : > { %v1324_v14 = vadd.f32 %v1307_v62, %v3006_v43 }
 0x21b   : > { %v1309_v5 = vpop.permute.xlu2 %1308 }
 0x21c   : > { %v1325_v23 = vadd.f32 %v1309_v5, %v3014_v45 }
 0x22b   : > { %v1338_v63 = vpop.permute.xlu0 %1337 }
 0x22c   : > { %v1357_v1 = vadd.f32 %v1338_v63, %v3008_v44 }
 0x22e   : > { %v3053_v2 = vsub.f32 %v1322_v0, %v1357_v1 }
 0x230   : > { %v1371_v3 = vmul.f32 %v3053_v2, %v3053_v2 }
 0x232   : > { %1386 = vrot.lane.b32.xlu1 %v1371_v3, %s3384_s2 }
 0x233   : > { %v1340_v6 = vpop.permute.xlu0 %1339  ;;  %v1346_v11 = vpop.permute.xlu2 %1345 }
 0x234   : > { %v1358_v8 = vadd.f32 %v1340_v6, %v3016_v46  ;;  %v1361_v15 = vadd.f32 %v1346_v11, %v3034_v50 }
 0x236   : > { %v3060_v9 = vsub.f32 %v1323_v7, %v1358_v8 }
 0x238   : > { %v1372_v10 = vmul.f32 %v3060_v9, %v3060_v9 }
 0x23a   : > { %1388 = vrot.lane.b32.xlu2 %v1372_v10, %s3384_s2  ;;  %1312 = vrot.lane.b32.xlu1 %v3049_v60, %s3387_s7  ;;  %s3414_s7 = sld [smem:[#allocation14_spill]] }
 0x23b   : > { %v1311_v12 = vpop.permute.xlu0 %1310  ;;  %v1342_v13 = vpop.permute.xlu1 %1341 }
 0x23c   : > { %v1326_v16 = vadd.f32 %v1311_v12, %v3022_v47  ;;  %v1359_v17 = vadd.f32 %v1342_v13, %v3024_v48  ;;  %v1348_v29 = vpop.permute.xlu2 %1347 }
 0x23d   : > { %v1362_v55 = vadd.f32 %v1348_v29, %v3038_v51 }
 0x23e   : > { %v3071_v18 = vsub.f32 %v1326_v16, %v1361_v15  ;;  %v3073_v19 = vsub.f32 %v1324_v14, %v1359_v17  ;;  %v1507_v14 = vld [vmem:[%s3114_s1 + $0x8] sm:$0xf]  ;;  %v2758_v16 = vmov 65535  }
 0x23f   : > { %v1513_v15 = vunpack.c.l.b16 %v1507_v14  ;;  %v1531_v17 = vsel %vm1530_vm5, 4294967295, %v2758_v16 }
 0x240   : > { %v1373_v20 = vmul.f32 %v3073_v19, %v3073_v19  ;;  %v1375_v21 = vmul.f32 %v3071_v18, %v3071_v18  ;;  %s3134_s9 = scalar_lea.vmem %s3414_s7, %s2595_s25  ;;  %s1049_s7 = scalar_lea.vmem %s3364_s13, %s2937_s3 }
 0x241   : > { %v1461_v14 = vld [vmem:[%s3134_s9 + $0x10] sm:$0xff] }
 0x242   : > { %1390 = vrot.lane.b32.xlu0 %v1373_v20, %s3384_s2  ;;  %1394 = vrot.lane.b32.xlu1 %v1375_v21, %s3384_s2  ;;  %v1532_v20 = vsel %vm1188_vm2, %v1531_v17, 0 }
 0x243   : > { %v1344_v22 = vpop.permute.xlu1 %1343 }
 0x244   : > { %v1360_v24 = vadd.f32 %v1344_v22, %v3030_v49  ;;  %v1515_v22 = vpack.c.b16 %v1513_v15, %v1513_v15  ;;  %v1462_v15 = vld [vmem:[%s3134_s9 + $0x18] sm:$0xff] }
 0x246   : > { %v3083_v25 = vsub.f32 %v1325_v23, %v1360_v24 }
 0x248   : > { %v1374_v26 = vmul.f32 %v3083_v25, %v3083_v25 }
 0x24a   : > { %1392 = vrot.lane.b32.xlu0 %v1374_v26, %s3384_s2  ;;  %v1534_v26 = vand.u32 %v1532_v20, %v1515_v22 }
 0x24c   : > { %1542 = vmatpush.bf16.msra.mxu3 %v1534_v26  ;;  %v1463_v26 = vld [vmem:[%s3134_s9 + $0x20] sm:$0xff] }
 0x284   : > { %v1385_v27 = vpop.permute.xlu0 %1384 }
 0x285   : > { %v1406_v28 = vsel %vm1405_vm4, %v1385_v27, 0.0 }
 0x286   : > { %1407 = vadd.xlane.f32.xlu2 %v1406_v28 }
 0x294   : > { %v1389_v30 = vpop.permute.xlu2 %1388 }
 0x295   : > { %v1412_v32 = vsel %vm1405_vm4, %v1389_v30, 0.0 }
 0x296   : > { %1413 = vadd.xlane.f32.xlu1 %v1412_v32 }
 0x2a4   : > { %v1387_v35 = vpop.permute.xlu1 %1386 }
 0x2a5   : > { %v1409_v36 = vsel %vm1405_vm4, %v1387_v35, 0.0 }
 0x2a6   : > { %1410 = vadd.xlane.f32.xlu0 %v1409_v36 }
 0x2ac   : > { %v1313_v37 = vpop.permute.xlu1 %1312 }
 0x2ad   : > { %v1327_v54 = vadd.f32 %v1313_v37, %v3049_v60 }
 0x2af   : > { %v3100_v56 = vsub.f32 %v1327_v54, %v1362_v55 }
 0x2b1   : > { %v1376_v57 = vmul.f32 %v3100_v56, %v3100_v56 }
 0x2b4   : > { %v1391_v38 = vpop.permute.xlu0 %1390  ;;  %v1395_v39 = vpop.permute.xlu1 %1394 }
 0x2b5   : > { %v1415_v40 = vsel %vm1405_vm4, %v1391_v38, 0.0  ;;  %v1421_v41 = vsel %vm1405_vm4, %v1395_v39, 0.0 }
 0x2b6   : > { %1416 = vadd.xlane.f32.xlu2 %v1415_v40  ;;  %1422 = vadd.xlane.f32.xlu1 %v1421_v41 }
 0x2bc   : > { %v1393_v52 = vpop.permute.xlu0 %1392 }
 0x2bd   : > { %v1418_v53 = vsel %vm1405_vm4, %v1393_v52, 0.0 }
 0x2be   : > { %1419 = vadd.xlane.f32.xlu0 %v1418_v53 }
 0x2ce   : > { %1396 = vrot.lane.b32.xlu2 %v1376_v57, %s3384_s2  ;;  %s1082_s2 = scalar_lea.vmem %s3373_s22, %s2934_s29 }
 0x2f9   : > { %v1408_v59 = vpop.xlane.xlu2 %1407 }
 0x2fa   : > { %v1427_v62 = vsub.f32 0.0, %v1408_v59  ;;  %v2582_v59 = vld [vmem:[%s3114_s1] sm:$0xff]  ;;  %s3419_s1 = smov 32  }
 0x2fb   : > { %1543 = vmatpush.bf16.msra.mxu3 %v2582_v59 }
 0x2fc   : > { %v1438_v63 = vmul.f32 %v3105_v61, %v1427_v62 }
 0x2fe   : > { %v1445_v3 = vmul.f32 1.442695, %v1438_v63  ;;  %v1459_v63 = vld [vmem:[%s3134_s9] sm:$0xff] }
 0x300   : > { %2673 = vpow2.f32 %v1445_v3 }
 0x306   : > { %v2674_v7 = vpop.eup %2673 }
 0x309   : > { %v1414_v6 = vpop.xlane.xlu1 %1413 }
 0x30a   : > { %v1429_v36 = vsub.f32 0.0, %v1414_v6 }
 0x30c   : > { %v1440_v38 = vmul.f32 %v3105_v61, %v1429_v36 }
 0x30e   : > { %v1449_v52 = vmul.f32 1.442695, %v1440_v38  ;;  %v1286_v38 = vadd.f32 %v3002_v42, %v2985_v31 }
 0x319   : > { %v1411_v0 = vpop.xlane.xlu0 %1410 }
 0x31a   : > { %v1428_v1 = vsub.f32 0.0, %v1411_v0  ;;  %v1460_v0 = vld [vmem:[%s3134_s9 + $0x8] sm:$0xff] }
 0x31c   : > { %v1439_v4 = vmul.f32 %v3105_v61, %v1428_v1 }
 0x31e   : > { %v1447_v5 = vmul.f32 1.442695, %v1439_v4 }
 0x320   : > { %2675 = vpow2.f32 %v1447_v5 }
 0x326   : > { %v2676_v8 = vpop.eup %2675 }
 0x327   : > { %v2647_v10 = vpack.i.bf16 %v2676_v8, %v2674_v7 }
 0x329   : > { %v1423_v11 = vpop.xlane.xlu1 %1422  ;;  %2648 = vrot.lane.b32.xlu0 %v2647_v10, %s2757_s26  ;;  %v1417_v12 = vpop.xlane.xlu2 %1416 }
 0x32a   : > { %v1432_v13 = vsub.f32 0.0, %v1423_v11  ;;  %v1430_v32 = vsub.f32 0.0, %v1417_v12 }
 0x32c   : > { %v1443_v21 = vmul.f32 %v3105_v61, %v1432_v13  ;;  %v1441_v37 = vmul.f32 %v3105_v61, %v1430_v32  ;;  %v2584_v32 = vld [vmem:[%s1049_s7 + $0x8] sm:$0xff] }
 0x32d   : > { %1645 = vmatpush.bf16.msra.mxu0 %v2584_v32 }
 0x32e   : > { %v1455_v29 = vmul.f32 1.442695, %v1443_v21  ;;  %v1451_v40 = vmul.f32 1.442695, %v1441_v37  ;;  %v1465_v37 = vld [vmem:[%s3134_s9 + $0x30] sm:$0xff] }
 0x330   : > { %2677 = vpow2.f32 %v1455_v29 }
 0x331   : > { %v1420_v23 = vpop.xlane.xlu0 %1419  ;;  %v1397_v24 = vpop.permute.xlu2 %1396 }
 0x332   : > { %v1431_v27 = vsub.f32 0.0, %v1420_v23  ;;  %v1424_v28 = vsel %vm1405_vm4, %v1397_v24, 0.0 }
 0x333   : > { %1425 = vadd.xlane.f32.xlu1 %v1424_v28 }
 0x334   : > { %v1442_v30 = vmul.f32 %v3105_v61, %v1431_v27  ;;  %v1464_v27 = vld [vmem:[%s3134_s9 + $0x28] sm:$0xff]  ;;  %s1076_s9 = scalar_lea.vmem %s3371_s20, %s2934_s29 }
 0x336   : > { %v1453_v35 = vmul.f32 1.442695, %v1442_v30  ;;  %v2678_v39 = vpop.eup %2677 }
 0x338   : > { %2679 = vpow2.f32 %v1453_v35  ;;  %v2583_v35 = vld [vmem:[%s1049_s7] sm:$0xff] }
 0x339   : > { %2681 = vpow2.f32 %v1451_v40  ;;  %1646 = vmatpush.bf16.msra.mxu0 %v2583_v35 }
 0x33a   : > { %2683 = vpow2.f32 %v1449_v52 }
 0x33e   : > { %v2680_v41 = vpop.eup %2679 }
 0x33f   : > { %v2657_v53 = vpack.i.bf16 %v2678_v39, %v2680_v41  ;;  %v2682_v54 = vpop.eup %2681  ;;  %v2666_v41 = vld [vmem:[%s1044_s27] ss:$0 sm:$0xff]  ;;  %s1079_s27 = scalar_lea.vmem %s3372_s21, %s2934_s29 }
 0x340   : > { %v2684_v55 = vpop.eup %2683 }
 0x341   : > { %2658 = vrot.lane.b32.xlu2 %v2657_v53, %s2757_s26  ;;  %v2652_v57 = vpack.i.bf16 %v2682_v54, %v2684_v55  ;;  %v1287_v55 = vadd.f32 %v3008_v44, %v2991_v34  ;;  %v1288_v34 = vadd.f32 %v3016_v46, %v2989_v33 }
 0x34c   : > { %2653 = vrot.lane.b32.xlu1 %v2652_v57, %s2757_s26 }
 0x39b   : > { %v2649_v62 = vpop.permute.xlu0 %2648 }
 0x39c   : > { %v2651_v1 = vunpack.i.h.bf16 %v2649_v62  ;;  %v2650_v3 = vunpack.i.l.bf16 %v2649_v62 }
 0x39e   : > { %v1494_v4 = vsel %vm1175_vm3, %v1459_v63, %v2650_v3  ;;  %v1495_v5 = vsel %vm1175_vm3, %v1460_v0, %v2651_v1 }
 0x39f   : > { %v1501_v6 = vpack.c.bf16 %v1495_v5, %v1494_v4  ;;  %v1289_v5 = vadd.f32 %v3024_v48, %v3006_v43  ;;  %v1291_v43 = vadd.f32 %v3034_v50, %v3022_v47  ;;  %v2585_v47 = vld [vmem:[%s1073_s24] sm:$0xff] }
 0x3a1   : > { %2507 = vmatmul.msk.bf16.vlgmr.msra.gmra.mxu3 %vm1517_vm6, %v1501_v6 }
 0x3a6   : > { %v1426_v7 = vpop.xlane.xlu1 %1425 }
 0x3a7   : > { %v1433_v8 = vsub.f32 0.0, %v1426_v7 }
 0x3a9   : > { %v1444_v10 = vmul.f32 %v3105_v61, %v1433_v8  ;;  %v2659_v61 = vpop.permute.xlu2 %2658 }
 0x3aa   : > { %v2661_v23 = vunpack.i.h.bf16 %v2659_v61  ;;  %v2660_v24 = vunpack.i.l.bf16 %v2659_v61 }
 0x3ab   : > { %v1457_v11 = vmul.f32 1.442695, %v1444_v10 }
 0x3ac   : > { %v1498_v28 = vsel %vm1175_vm3, %v1463_v26, %v2660_v24  ;;  %v1499_v29 = vsel %vm1175_vm3, %v1464_v27, %v2661_v23 }
 0x3ad   : > { %2685 = vpow2.f32 %v1457_v11  ;;  %v1503_v30 = vpack.c.bf16 %v1499_v29, %v1498_v28 }
 0x3b3   : > { %v2686_v12 = vpop.eup %2685 }
 0x3b4   : > { %1485 = vrot.lane.b32.xlu0 %v2686_v12, %s2757_s26  ;;  %s2448_s26 = sshll.u32 %s2934_s29, 2 }
 0x3be   : > { %v2654_v13 = vpop.permute.xlu1 %2653 }
 0x3bf   : > { %v2656_v16 = vunpack.i.h.bf16 %v2654_v13  ;;  %v2655_v17 = vunpack.i.l.bf16 %v2654_v13 }
 0x3c1   : > { %v1496_v20 = vsel %vm1175_vm3, %v1461_v14, %v2655_v17  ;;  %v1497_v21 = vsel %vm1175_vm3, %v1462_v15, %v2656_v16  ;;  %v1290_v16 = vadd.f32 %v3030_v49, %v3014_v45  ;;  %v2586_v45 = vld [vmem:[%s1073_s24 + $0x8] sm:$0xff]  ;;  %v1292_v49 = vadd.f32 %v3038_v51, %v3049_v60  ;;  %s3417_s24 = sld [smem:[#allocation19_spill]] }
 0x3c2   : > { %v1502_v22 = vpack.c.bf16 %v1497_v21, %v1496_v20  ;;  %1730 = vmatpush.bf16.msrb.mxu1 %v2586_v45 }
 0x3c4   : > { %2508 = vmatmul.msk.bf16.gmra.mxu3 %vm1517_vm6, %v1502_v22 }
 0x3c6   : > { %1731 = vmatpush.bf16.msrb.mxu1 %v2585_v47 }
 0x3d4   : > { %2509 = vmatmul.msk.bf16.gmra.mxu3 %vm1517_vm6, %v1503_v30  ;;  %v2667_v30 = vld [vmem:[%s1052_s4] ss:$0 sm:$0xff] }
 0x424   : > { %v1545_v36 = vpop.f32.mrf.mxu3 }
 0x425   : > { %v1564_v40 = vadd.f32 %v1545_v36, %v1286_v38 }
 0x426   : > { %v1486_v39 = vpop.permute.xlu0 %1485 }
 0x427   : > { %v1500_v52 = vsel %vm1175_vm3, %v1465_v37, %v1486_v39  ;;  %v1575_v54 = vadd.f32 %v2666_v41, %v1564_v40 }
 0x428   : > { %v1504_v53 = vpack.c.bf16 %v1500_v52, %v1500_v52 }
 0x429   : > { %v1589_v31 = vmul.f32 0.01, %v1575_v54  ;;  %vm1582_vm7 = vcmp.ge.f32.partialorder %v1575_v54, 0.0 }
 0x42a   : > { %2510 = vmatmul.msk.bf16.gmra.mxu3 %vm1517_vm6, %v1504_v53 }
 0x42b   : > { %v1596_v63 = vsel %vm1582_vm7, %v1575_v54, %v1589_v31 }
 0x42c   : > { %v1547_v57 = vpop.f32.mrf.mxu3 }
 0x42d   : > { %v1565_v59 = vadd.f32 %v1547_v57, %v1287_v55 }
 0x42f   : > { %v1576_v42 = vadd.f32 %v2666_v41, %v1565_v59 }
 0x431   : > { %vm1583_vm8 = vcmp.ge.f32.partialorder %v1576_v42, 0.0  ;;  %v1590_v62 = vmul.f32 0.01, %v1576_v42 }
 0x433   : > { %v1597_v0 = vsel %vm1583_vm8, %v1576_v42, %v1590_v62  ;;  %vm1991_vm8 = vcmask 523264  }
 0x434   : > { %v1603_v1 = vpack.c.bf16 %v1597_v0, %v1596_v63 }
 0x436   : > { %2519 = vmatmul.msk.bf16.vlgmr.msra.gmra.mxu0 %vm1108_vm0, %v1603_v1 }
 0x447   : > { %v1550_v3 = vpop.f32.mrf.mxu3 }
 0x448   : > { %v1566_v44 = vadd.f32 %v1550_v3, %v1288_v34 }
 0x44a   : > { %v1577_v4 = vadd.f32 %v2666_v41, %v1566_v44 }
 0x44c   : > { %v1591_v8 = vmul.f32 0.01, %v1577_v4  ;;  %vm1584_vm9 = vcmp.ge.f32.partialorder %v1577_v4, 0.0 }
 0x44e   : > { %v1598_v12 = vsel %vm1584_vm9, %v1577_v4, %v1591_v8  ;;  %vm2038_vm9 = vcmask 654336  }
 0x44f   : > { %v1552_v6 = vpop.f32.mrf.mxu3 }
 0x450   : > { %v1567_v7 = vadd.f32 %v1552_v6, %v1289_v5 }
 0x452   : > { %v1578_v10 = vadd.f32 %v2666_v41, %v1567_v7 }
 0x454   : > { %vm1585_vm10 = vcmp.ge.f32.partialorder %v1578_v10, 0.0  ;;  %v1592_v11 = vmul.f32 0.01, %v1578_v10 }
 0x456   : > { %v1599_v13 = vsel %vm1585_vm10, %v1578_v10, %v1592_v11 }
 0x457   : > { %v1555_v14 = vpop.f32.mrf.mxu3  ;;  %v1604_v15 = vpack.c.bf16 %v1599_v13, %v1598_v12 }
 0x458   : > { %v1568_v33 = vadd.f32 %v1555_v14, %v1290_v16 }
 0x459   : > { %2520 = vmatmul.msk.bf16.gmra.mxu0 %vm1108_vm0, %v1604_v15  ;;  %v2668_v15 = vld [vmem:[%s1076_s9] ss:$0 sm:$0xff]  ;;  %s3416_s9 = sld [smem:[#allocation17_spill]] }
 0x45a   : > { %v1579_v46 = vadd.f32 %v2666_v41, %v1568_v33 }
 0x45c   : > { %v1593_v20 = vmul.f32 0.01, %v1579_v46  ;;  %vm1586_vm11 = vcmp.ge.f32.partialorder %v1579_v46, 0.0 }
 0x45e   : > { %v1600_v61 = vsel %vm1586_vm11, %v1579_v46, %v1593_v20  ;;  %v2669_v46 = vld [vmem:[%s1079_s27] ss:$0 sm:$0xff]  ;;  %s2760_s27 = smov 3  }
 0x45f   : > { %v1557_v48 = vpop.f32.mrf.mxu3  ;;  %s1016_s4 = scalar_lea.vmem %s3416_s9, %s2448_s26  ;;  %s3418_s26 = smov 125  }
 0x460   : > { %v1569_v17 = vadd.f32 %v1557_v48, %v1291_v43 }
 0x462   : > { %v1580_v21 = vadd.f32 %v2666_v41, %v1569_v17 }
 0x464   : > { %vm1587_vm12 = vcmp.ge.f32.partialorder %v1580_v21, 0.0  ;;  %v1594_v22 = vmul.f32 0.01, %v1580_v21 }
 0x466   : > { %v1601_v23 = vsel %vm1587_vm12, %v1580_v21, %v1594_v22 }
 0x467   : > { %v1605_v24 = vpack.c.bf16 %v1601_v23, %v1600_v61 }
 0x469   : > { %2521 = vmatmul.msk.bf16.gmra.mxu0 %vm1108_vm0, %v1605_v24 }
 0x4ad   : > { %v1560_v50 = vpop.f32.mrf.mxu3 }
 0x4ae   : > { %v1570_v26 = vadd.f32 %v1560_v50, %v1292_v49 }
 0x4b0   : > { %v1581_v27 = vadd.f32 %v2666_v41, %v1570_v26 }
 0x4b2   : > { %v1595_v28 = vmul.f32 0.01, %v1581_v27  ;;  %vm1588_vm13 = vcmp.ge.f32.partialorder %v1581_v27, 0.0 }
 0x4b3   : > { %v1648_v29 = vpop.f32.mrf.mxu0 }
 0x4b4   : > { %v1602_v32 = vsel %vm1588_vm13, %v1581_v27, %v1595_v28  ;;  %v1649_v37 = vadd.f32 %v2667_v30, %v1648_v29 }
 0x4b5   : > { %v1562_v35 = vpop.f32.mrf.mxu3  ;;  %v1606_v36 = vpack.c.bf16 %v1602_v32, %v1602_v32 }
 0x4b6   : > { %v1667_v60 = vpack.c.bf16 %v1649_v37, %v1649_v37 }
 0x4b7   : > { %2522 = vmatmul.msk.bf16.gmra.mxu0 %vm1108_vm0, %v1606_v36 }
 0x4b8   : > { %v1689_v40 = vunpack.c.l.b16 %v1667_v60 }
 0x4bb   : > { %v1650_v51 = vpop.f32.mrf.mxu0 }
 0x4bc   : > { %v1651_v38 = vadd.f32 %v2667_v30, %v1650_v51 }
 0x4be   : > { %v1668_v39 = vpack.c.bf16 %v1651_v38, %v1651_v38 }
 0x4c0   : > { %v1690_v41 = vunpack.c.l.b16 %v1668_v39 }
 0x4c2   : > { %v3200_v52 = vpack.c.b16 %v1690_v41, %v1689_v40 }
 0x4c4   : > { %2531 = vmatmul.msk.bf16.vlgmr.msrb.gmra.mxu1 %vm1108_vm0, %v3200_v52 }
 0x4d6   : > { %v1653_v53 = vpop.f32.mrf.mxu0 }
 0x4d7   : > { %v1654_v54 = vadd.f32 %v2667_v30, %v1653_v53 }
 0x4d9   : > { %v1669_v57 = vpack.c.bf16 %v1654_v54, %v1654_v54 }
 0x4db   : > { %v1691_v42 = vunpack.c.l.b16 %v1669_v57 }
 0x4de   : > { %v1655_v55 = vpop.f32.mrf.mxu0 }
 0x4df   : > { %v1656_v59 = vadd.f32 %v2667_v30, %v1655_v55 }
 0x4e1   : > { %v1670_v31 = vpack.c.bf16 %v1656_v59, %v1656_v59 }
 0x4e3   : > { %v1692_v62 = vunpack.c.l.b16 %v1670_v31 }
 0x4e5   : > { %v3208_v63 = vpack.c.b16 %v1692_v62, %v1691_v42 }
 0x4e6   : > { %v1658_v0 = vpop.f32.mrf.mxu0 }
 0x4e7   : > { %2532 = vmatmul.msk.bf16.gmra.mxu1 %vm1108_vm0, %v3208_v63  ;;  %v1659_v1 = vadd.f32 %v2667_v30, %v1658_v0 }
 0x4e9   : > { %v1671_v34 = vpack.c.bf16 %v1659_v1, %v1659_v1 }
 0x4eb   : > { %v1693_v5 = vunpack.c.l.b16 %v1671_v34 }
 0x4ee   : > { %v1660_v3 = vpop.f32.mrf.mxu0 }
 0x4ef   : > { %v1661_v44 = vadd.f32 %v2667_v30, %v1660_v3 }
 0x4f1   : > { %v1672_v4 = vpack.c.bf16 %v1661_v44, %v1661_v44 }
 0x4f3   : > { %v1694_v6 = vunpack.c.l.b16 %v1672_v4  ;;  %v2759_v4 = vmov 0  }
 0x4f4   : > { %2663 = vset.pattern.permute.xlu2 %v2759_v4  ;;  %2664 = vset.pattern.permute.xlu1 %v2759_v4 }
 0x4f5   : > { %v3212_v7 = vpack.c.b16 %v1694_v6, %v1693_v5  ;;  %2662 = vset.pattern.permute.xlu0 %v2759_v4 }
 0x4f7   : > { %2533 = vmatmul.msk.bf16.gmra.mxu1 %vm1108_vm0, %v3212_v7 }
 0x534   : > { %v1663_v8 = vpop.f32.mrf.mxu0 }
 0x535   : > { %v1664_v10 = vadd.f32 %v2667_v30, %v1663_v8  ;;  %v2670_v8 = vld [vmem:[%s1082_s2] ss:$0 sm:$0xff]  ;;  %s3415_s2 = sld [smem:[#allocation18_spill]] }
 0x537   : > { %v1673_v11 = vpack.c.bf16 %v1664_v10, %v1664_v10 }
 0x539   : > { %v1695_v12 = vunpack.c.l.b16 %v1673_v11 }
 0x53b   : > { %v3216_v13 = vpack.c.b16 %v1695_v12, %v1695_v12  ;;  %s1020_s7 = scalar_lea.vmem %s3415_s2, %s2940_s0  ;;  %s1024_s2 = scalar_lea.vmem %s3417_s24, %s2940_s0 }
 0x53c   : > { %v1665_v14 = vpop.f32.mrf.mxu0  ;;  %s1060_s24 = scalar_lea.vmem %s3367_s16, %s2934_s29 }
 0x53d   : > { %2534 = vmatmul.msk.bf16.gmra.mxu1 %vm1108_vm0, %v3216_v13 }
 0x541   : > { %v1733_v16 = vpop.f32.mrf.mxu1 }
 0x542   : > { %v1734_v33 = vadd.f32 %v2668_v15, %v1733_v16 }
 0x544   : > { %vm1752_vm14 = vcmp.ge.f32.partialorder %v1734_v33, 0.0  ;;  %v1759_v43 = vmul.f32 0.01, %v1734_v33 }
 0x546   : > { %v1766_v48 = vsel %vm1752_vm14, %v1734_v33, %v1759_v43 }
 0x547   : > { %v1777_v17 = vmul.f32 %v2669_v46, %v1766_v48 }
 0x549   : > { %v1735_v20 = vpop.f32.mrf.mxu1  ;;  %v1784_v21 = vsel %vm1108_vm0, %v1777_v17, 0.0 }
 0x54a   : > { %v1736_v22 = vadd.f32 %v2668_v15, %v1735_v20  ;;  %1785 = vadd.xlane.f32.xlu2 %v1784_v21 }
 0x54c   : > { %vm1753_vm15 = vcmp.ge.f32.partialorder %v1736_v22, 0.0  ;;  %v1760_v61 = vmul.f32 0.01, %v1736_v22 }
 0x54e   : > { %v1767_v23 = vsel %vm1753_vm15, %v1736_v22, %v1760_v61 }
 0x54f   : > { %v1778_v24 = vmul.f32 %v2669_v46, %v1767_v23 }
 0x551   : > { %v1787_v45 = vsel %vm1108_vm0, %v1778_v24, 0.0 }
 0x552   : > { %1788 = vadd.xlane.f32.xlu1 %v1787_v45 }
 0x564   : > { %v1738_v47 = vpop.f32.mrf.mxu1 }
 0x565   : > { %v1739_v49 = vadd.f32 %v2668_v15, %v1738_v47 }
 0x567   : > { %vm1754_vm3 = vcmp.ge.f32.partialorder %v1739_v49, 0.0  ;;  %v1761_v50 = vmul.f32 0.01, %v1739_v49 }
 0x569   : > { %v1768_v26 = vsel %vm1754_vm3, %v1739_v49, %v1761_v50 }
 0x56a   : > { %v1779_v27 = vmul.f32 %v2669_v46, %v1768_v26 }
 0x56c   : > { %v1740_v28 = vpop.f32.mrf.mxu1  ;;  %v1790_v29 = vsel %vm1108_vm0, %v1779_v27, 0.0 }
 0x56d   : > { %v1741_v30 = vadd.f32 %v2668_v15, %v1740_v28  ;;  %1791 = vadd.xlane.f32.xlu2 %v1790_v29 }
 0x56f   : > { %vm1755_vm4 = vcmp.ge.f32.partialorder %v1741_v30, 0.0  ;;  %v1762_v32 = vmul.f32 0.01, %v1741_v30 }
 0x571   : > { %v1769_v35 = vsel %vm1755_vm4, %v1741_v30, %v1762_v32 }
 0x572   : > { %v1780_v36 = vmul.f32 %v2669_v46, %v1769_v35 }
 0x574   : > { %v1743_v37 = vpop.f32.mrf.mxu1  ;;  %v1793_v51 = vsel %vm1108_vm0, %v1780_v36, 0.0 }
 0x575   : > { %v1744_v60 = vadd.f32 %v2668_v15, %v1743_v37  ;;  %1794 = vadd.xlane.f32.xlu0 %v1793_v51 }
 0x577   : > { %vm1756_vm5 = vcmp.ge.f32.partialorder %v1744_v60, 0.0  ;;  %v1763_v38 = vmul.f32 0.01, %v1744_v60 }
 0x579   : > { %v1770_v39 = vsel %vm1756_vm5, %v1744_v60, %v1763_v38 }
 0x57a   : > { %v1781_v40 = vmul.f32 %v2669_v46, %v1770_v39 }
 0x57c   : > { %v1745_v41 = vpop.f32.mrf.mxu1  ;;  %v1796_v53 = vsel %vm1108_vm0, %v1781_v40, 0.0 }
 0x57d   : > { %v1746_v54 = vadd.f32 %v2668_v15, %v1745_v41  ;;  %1797 = vadd.xlane.f32.xlu0 %v1796_v53 }
 0x57f   : > { %vm1757_vm6 = vcmp.ge.f32.partialorder %v1746_v54, 0.0  ;;  %v1764_v55 = vmul.f32 0.01, %v1746_v54 }
 0x581   : > { %v1771_v57 = vsel %vm1757_vm6, %v1746_v54, %v1764_v55 }
 0x582   : > { %v1782_v59 = vmul.f32 %v2669_v46, %v1771_v57 }
 0x584   : > { %v1799_v31 = vsel %vm1108_vm0, %v1782_v59, 0.0 }
 0x585   : > { %1800 = vadd.xlane.f32.xlu1 %v1799_v31 }
 0x5ba   : > { %v1748_v42 = vpop.f32.mrf.mxu1 }
 0x5bb   : > { %v1749_v62 = vadd.f32 %v2668_v15, %v1748_v42 }
 0x5bd   : > { %vm1758_vm7 = vcmp.ge.f32.partialorder %v1749_v62, 0.0  ;;  %v1765_v0 = vmul.f32 0.01, %v1749_v62  ;;  %v1786_v6 = vpop.xlane.xlu2 %1785 }
 0x5bf   : > { %v1772_v1 = vsel %vm1758_vm7, %v1749_v62, %v1765_v0 }
 0x5c0   : > { %v1783_v3 = vmul.f32 %v2669_v46, %v1772_v1  ;;  %v1809_v46 = vadd.f32 %v2670_v8, %v1786_v6 }
 0x5c2   : > { %v1750_v34 = vpop.f32.mrf.mxu1  ;;  %v1802_v44 = vsel %vm1108_vm0, %v1783_v3, 0.0 }
 0x5c3   : > { %1803 = vadd.xlane.f32.xlu2 %v1802_v44  ;;  %v1086_v44 = vld [vmem:[%s1020_s7] sm:$0xff]  ;;  %s2761_s7 = smov 64  }
 0x5c5   : > { %v1789_v10 = vpop.xlane.xlu1 %1788 }
 0x5c6   : > { %v1810_v48 = vadd.f32 %v2670_v8, %v1789_v10 }
 0x5e0   : > { %v1792_v14 = vpop.xlane.xlu2 %1791 }
 0x5e1   : > { %v1811_v16 = vadd.f32 %v2670_v8, %v1792_v14 }
 0x5e8   : > { %v1795_v5 = vpop.xlane.xlu0 %1794 }
 0x5e9   : > { %v1812_v43 = vadd.f32 %v2670_v8, %v1795_v5 }
 0x5f0   : > { %v1798_v11 = vpop.xlane.xlu0 %1797 }
 0x5f1   : > { %v1813_v12 = vadd.f32 %v2670_v8, %v1798_v11 }
 0x5f3   : > { %1838 = vperm.xlu2 %2663, %v1813_v12  }
 0x5f8   : > { %v1801_v15 = vpop.xlane.xlu1 %1800 }
 0x5f9   : > { %v1814_v33 = vadd.f32 %v2670_v8, %v1801_v15 }
 0x5fb   : > { %1843 = vperm.xlu1 %2664, %v1814_v33   ;;  %1828 = vperm.xlu2 %2663, %v1811_v16  }
 0x603   : > { %1833 = vperm.xlu1 %2664, %v1812_v43   ;;  %1818 = vperm.xlu2 %2663, %v1809_v46  }
 0x60b   : > { %1823 = vperm.xlu1 %2664, %v1810_v48  }
 0x636   : > { %v1804_v17 = vpop.xlane.xlu2 %1803 }
 0x637   : > { %v1815_v20 = vadd.f32 %v2670_v8, %v1804_v17 }
 0x639   : > { %1848 = vperm.xlu0 %2662, %v1815_v20  }
 0x64d   : > { %v1839_v21 = vpop.permute.xlu2 %1838 }
 0x64e   : > { %v1855_v22 = vmul.f32 %v1839_v21, %v3083_v25 }
 0x650   : > { %v1862_v61 = vpack.c.bf16 %v1855_v22, %v1855_v22 }
 0x652   : > { %v1869_v24 = vunpack.c.l.bf16 %v1862_v61  ;;  %v1897_v28 = vunpack.c.l.b16 %v1862_v61 }
 0x654   : > { %v1876_v50 = vsub.f32 %v1855_v22, %v1869_v24 }
 0x655   : > { %v1829_v23 = vpop.permute.xlu2 %1828 }
 0x656   : > { %v1853_v45 = vmul.f32 %v1829_v23, %v3060_v9  ;;  %v1883_v32 = vpack.c.bf16 %v1876_v50, %v1876_v50 }
 0x658   : > { %v1860_v26 = vpack.c.bf16 %v1853_v45, %v1853_v45  ;;  %v1915_v39 = vunpack.c.l.b16 %v1883_v32 }
 0x65a   : > { %v1867_v35 = vunpack.c.l.bf16 %v1860_v26  ;;  %v1895_v41 = vunpack.c.l.b16 %v1860_v26 }
 0x65c   : > { %v1874_v9 = vsub.f32 %v1853_v45, %v1867_v35 }
 0x65d   : > { %v1819_v38 = vpop.permute.xlu2 %1818 }
 0x65e   : > { %v1851_v53 = vmul.f32 %v1819_v38, %v3044_v58  ;;  %v1881_v59 = vpack.c.bf16 %v1874_v9, %v1874_v9  ;;  %v2590_v38 = vld [vmem:[%s1057_s10 + $0x18] sm:$0xff]  ;;  %v2588_v9 = vld [vmem:[%s1057_s10 + $0x8] sm:$0xff] }
 0x660   : > { %v1913_v3 = vunpack.c.l.b16 %v1881_v59 }
 0x66d   : > { %v1844_v47 = vpop.permute.xlu1 %1843 }
 0x66e   : > { %v1856_v49 = vmul.f32 %v1844_v47, %v3071_v18 }
 0x670   : > { %v1863_v27 = vpack.c.bf16 %v1856_v49, %v1856_v49 }
 0x672   : > { %v1870_v29 = vunpack.c.l.bf16 %v1863_v27  ;;  %v1898_v30 = vunpack.c.l.b16 %v1863_v27 }
 0x674   : > { %v1877_v36 = vsub.f32 %v1856_v49, %v1870_v29  ;;  %v1902_v37 = vpack.c.b16 %v1898_v30, %v1897_v28 }
 0x675   : > { %v1834_v51 = vpop.permute.xlu1 %1833 }
 0x676   : > { %v1884_v25 = vpack.c.bf16 %v1877_v36, %v1877_v36  ;;  %v1854_v60 = vmul.f32 %v1834_v51, %v3073_v19  ;;  %v1858_v19 = vpack.c.bf16 %v1851_v53, %v1851_v53  ;;  %v1935_v27 = vsel %vm1108_vm0, %v3212_v7, %v1902_v37  ;;  %v1949_v36 = vld [vmem:[%s1016_s4] sm:$0xf] }
 0x678   : > { %v1916_v40 = vunpack.c.l.b16 %v1884_v25  ;;  %v1861_v18 = vpack.c.bf16 %v1854_v60, %v1854_v60  ;;  %v1893_v4 = vunpack.c.l.b16 %v1858_v19  ;;  %v1865_v15 = vunpack.c.l.bf16 %v1858_v19 }
 0x67a   : > { %v1868_v54 = vunpack.c.l.bf16 %v1861_v18  ;;  %v1896_v55 = vunpack.c.l.b16 %v1861_v18  ;;  %v1920_v57 = vpack.c.b16 %v1916_v40, %v1915_v39  ;;  %v1872_v43 = vsub.f32 %v1851_v53, %v1865_v15  ;;  %v2589_v39 = vld [vmem:[%s1057_s10 + $0x10] sm:$0xff]  ;;  %v2587_v40 = vld [vmem:[%s1057_s10] sm:$0xff] }
 0x67c   : > { %v1875_v31 = vsub.f32 %v1854_v60, %v1868_v54  ;;  %v1901_v42 = vpack.c.b16 %v1896_v55, %v1895_v41  ;;  %1926 = vrot.lane.b32.xlu2 %v1920_v57, %s2760_s27  ;;  %v1879_v21 = vpack.c.bf16 %v1872_v43, %v1872_v43  ;;  %v2591_v60 = vld [vmem:[%s1057_s10 + $0x20] sm:$0xff]  ;;  %s2108_s10 = scalar_select %p652_p2, 1, 0 }
 0x67d   : > { %v1824_v62 = vpop.permute.xlu1 %1823  ;;  %2045 = vmatpush.bf16.msrb.mxu3 %v2591_v60  ;;  %v2687_v57 = vld [vmem:[%s2950_s28] sm:$0xff] }
 0x67e   : > { %v1882_v0 = vpack.c.bf16 %v1875_v31, %v1875_v31  ;;  %v1852_v1 = vmul.f32 %v1824_v62, %v3053_v2  ;;  %v1911_v61 = vunpack.c.l.b16 %v1879_v21  ;;  %v1933_v30 = vsel %vm1108_vm0, %v3208_v63, %v1901_v42  ;;  %v1981_v63 = vld [vmem:[%s1024_s2] sm:$0xff]  ;;  %s3420_s2 = smov 96   ;;  %s2109_s9 = scvt.s32.f32 %s2108_s10 }
 0x67f   : > { %v2098_v62 = vld [vmem:[%s1028_s6] sm:$0xff] }
 0x680   : > { %v1914_v58 = vunpack.c.l.b16 %v1882_v0  ;;  %v1859_v34 = vpack.c.bf16 %v1852_v1, %v1852_v1  ;;  %v2099_v19 = vmul.f32 0.25, %v2098_v62  ;;  %v2688_v0 = vld [vmem:[%s2956_s23] sm:$0xff]  ;;  %s2112_s25 = ssub.f32 1.0, %s2109_s9 }
 0x681   : > { %2046 = vmatpush.bf16.msrb.mxu3 %v2590_v38 }
 0x682   : > { %v1894_v5 = vunpack.c.l.b16 %v1859_v34  ;;  %v1919_v6 = vpack.c.b16 %v1914_v58, %v1913_v3  ;;  %v1866_v2 = vunpack.c.l.bf16 %v1859_v34  ;;  %v2113_v58 = vstv %s2112_s25 }
 0x683   : > { %v2110_v34 = vstv %s2109_s9 }
 0x684   : > { %v1900_v8 = vpack.c.b16 %v1894_v5, %v1893_v4  ;;  %1971 = vperm.xlu2 %2663, %v1086_v44   ;;  %1924 = vrot.lane.b32.xlu1 %v1919_v6, %s2760_s27  ;;  %v1873_v33 = vsub.f32 %v1852_v1, %v1866_v2  ;;  %v2100_v1 = vmul.f32 0.75, %v2688_v0  ;;  %v2114_v5 = vmul.f32 %v2688_v0, %v2113_v58 }
 0x685   : > { %2047 = vmatpush.bf16.msrb.mxu3 %v2589_v39 }
 0x686   : > { %v1880_v17 = vpack.c.bf16 %v1873_v33, %v1873_v33  ;;  %v1931_v7 = vsel %vm1108_vm0, %v3200_v52, %v1900_v8  ;;  %v2101_v3 = vadd.f32 %v2100_v1, %v2099_v19 }
 0x688   : > { %v1912_v22 = vunpack.c.l.b16 %v1880_v17 }
 0x689   : > { %2048 = vmatpush.bf16.msrb.mxu3 %v2588_v9 }
 0x68a   : > { %v1918_v23 = vpack.c.b16 %v1912_v22, %v1911_v61 }
 0x68d   : > { %2049 = vmatpush.bf16.msrb.mxu3 %v2587_v40 }
 0x6ab   : > { %v1849_v10 = vpop.permute.xlu0 %1848 }
 0x6ac   : > { %v1857_v11 = vmul.f32 %v1849_v10, %v3100_v56 }
 0x6ae   : > { %v1864_v12 = vpack.c.bf16 %v1857_v11, %v1857_v11 }
 0x6b0   : > { %v1871_v14 = vunpack.c.l.bf16 %v1864_v12  ;;  %v1899_v56 = vunpack.c.l.b16 %v1864_v12  ;;  %v2671_v12 = vld [vmem:[%s1060_s24] ss:$0 sm:$0xff] }
 0x6b2   : > { %v1878_v16 = vsub.f32 %v1857_v11, %v1871_v14  ;;  %v1903_v24 = vpack.c.b16 %v1899_v56, %v1899_v56 }
 0x6b4   : > { %v1885_v46 = vpack.c.bf16 %v1878_v16, %v1878_v16  ;;  %v1937_v47 = vsel %vm1108_vm0, %v3216_v13, %v1903_v24 }
 0x6b6   : > { %v1917_v48 = vunpack.c.l.b16 %v1885_v46 }
 0x6b8   : > { %v1921_v20 = vpack.c.b16 %v1917_v48, %v1917_v48 }
 0x6ba   : > { %1928 = vrot.lane.b32.xlu0 %v1921_v20, %s2760_s27  ;;  %v2096_v20 = vmul.f32 0.5, %v2687_v57 }
 0x6c2   : > { %1922 = vrot.lane.b32.xlu0 %v1918_v23, %s2760_s27  ;;  %s1068_s27 = scalar_lea.vmem %s3369_s18, %s2934_s29  ;;  %s3421_s29 = sld [smem:[#allocation22_spill]] }
 0x6c3   : > { %v2672_v43 = vld [vmem:[%s1068_s27] ss:$0 sm:$0xff] }
 0x6ca   : > { %1987 = vrot.lane.b32.xlu0 %v1981_v63, %s2761_s7  ;;  %s2709_s7 = scalar_lea.hbm %s3421_s29, 16 }
 0x6d6   : > { %v1927_v26 = vpop.permute.xlu2 %1926 }
 0x6d7   : > { %v1945_v28 = vsel %vm1139_vm1, %v1935_v27, %v1927_v26 }
 0x6de   : > { %v1972_v37 = vpop.permute.xlu2 %1971 }
 0x6f6   : > { %v1925_v29 = vpop.permute.xlu1 %1924 }
 0x6f7   : > { %v1942_v13 = vsel %vm1139_vm1, %v1933_v30, %v1925_v29 }
 0x72c   : > { %v1929_v45 = vpop.permute.xlu0 %1928 }
 0x72d   : > { %v1948_v49 = vsel %vm1139_vm1, %v1937_v47, %v1929_v45 }
 0x72e   : > { %v1954_v50 = vsel %vm1188_vm2, %v1948_v49, 0  ;;  %vm1950_vm2 = vcmask 457728  }
 0x72f   : > { %1960 = vmatpush.bf16.msrb.mxu2 %v1954_v50 }
 0x733   : > { %1961 = vmatpush.bf16.msrb.mxu2 %v1945_v28 }
 0x734   : > { %v1923_v32 = vpop.permute.xlu0 %1922 }
 0x735   : > { %v1939_v35 = vsel %vm1139_vm1, %v1931_v7, %v1923_v32 }
 0x737   : > { %1962 = vmatpush.bf16.msrb.mxu2 %v1942_v13 }
 0x73b   : > { %1963 = vmatpush.bf16.msrb.mxu2 %v1939_v35 }
 0x73c   : > { %v1988_v54 = vpop.permute.xlu0 %1987 }
 0x73e   : > { %2535 = vmatmul.msk.bf16.vlgmr.msrb.gmra.mxu2 %vm1950_vm2, %v1949_v36 }
 0x7c1   : > { %v1965_v51 = vpop.f32.mrf.mxu2 }
 0x7c2   : > { %v1974_v25 = vmul.f32 %v1972_v37, %v1965_v51  ;;  %1976 = vrot.lane.b32.xlu2 %v1965_v51, %s3418_s26  ;;  %s2567_s26 = sshll.u32 %s2903_s5, 3 }
 0x7c3   : > { %s2134_s24 = scalar_lea.hbm %s3421_s29, %s2567_s26 }
 0x7c4   : > { %1983 = vrot.lane.b32.xlu1 %v1974_v25, %s3419_s1  ;;  %s2138_s0 = sshll.u32 %s2134_s24, 4  ;;  %s2139_s0 = int_to_ptr.hbm [resolvable:$true] %s2138_s0 }
 0x7c5   : > { %s2703_s27 = sshra.s32 %s2139_s0, 4  ;;  %s2704_s27 = int_to_ptr.hbm [resolvable:$true] %s2703_s27 }
 0x7c6   : > { %s2705_s23 = scalar_lea.hbm %s2704_s27, 8  ;;  %p2710_p0 = scmp.lt.s32.totalorder %s2704_s27, %s3421_s29 }
 0x7c7   : > { %p2706_p11 = scmp.ne.s32.totalorder %s2704_s27, %s2705_s23  ;;  %p2711_p1 = scmp.lt.s32.totalorder %s2709_s7, %s2705_s23 }
 0x7c9   : > { %v1967_v52 = vpop.f32.mrf.mxu2  ;;  %p2707_p12 = pnand %p2706_p11, %p2922_p5  ;;  %p2712_p2 = por %p2711_p1, %p2710_p0 }
 0x7cb   : > { %p2708_p13 = pneg %p2707_p12 }
 0x7cd   : > { %p2713_p3 = pnand %p2712_p2, %p2708_p13 }
 0x81c   : > { %v1977_v18 = vpop.permute.xlu2 %1976 }
 0x81d   : > { %v1979_v41 = vadd.f32 %v1977_v18, %v1965_v51 }
 0x81f   : > { %v1980_v53 = vmul.f32 %v1979_v41, %v1972_v37 }
 0x821   : > { %2103 = vrot.lane.b32.xlu1 %v1980_v53, %s3420_s2  ;;  %s1065_s2 = scalar_lea.vmem %s3368_s17, %s2937_s3  ;;  %s987_s3 = sand.u32 1, %s2743_s30  }
 0x822   : > { %v2593_v10 = vld [vmem:[%s1065_s2 + $0x8] sm:$0xff]  ;;  %v2592_v11 = vld [vmem:[%s1065_s2] sm:$0xff]  ;;  %s2124_s5 = scalar_lea.sflag [#allocation3], %s987_s3 }
 0x823   : > { %2088 = vmatpush.bf16.msra.mxu2 %v2593_v10 }
 0x827   : > { %2089 = vmatpush.bf16.msra.mxu2 %v2592_v11 }
 0x836   : > { %v1984_v55 = vpop.permute.xlu1 %1983 }
 0x837   : > { %v1990_v59 = vsel %vm1108_vm0, %v2687_v57, %v1984_v55 }
 0x838   : > { %v1992_v31 = vsel %vm1991_vm8, %v1990_v59, %v1988_v54 }
 0x839   : > { %v1993_v42 = vpack.c.bf16 %v1992_v31, %v1992_v31 }
 0x83b   : > { %2556 = vmatmul.msk.bf16.vlgmr.msrb.gmra.mxu3 %vm2038_vm9, %v1993_v42 }
 0x893   : > { %v2104_v44 = vpop.permute.xlu1 %2103 }
 0x894   : > { %v2106_v4 = vadd.f32 %v2104_v44, %v2101_v3 }
 0x896   : > { %v2111_v6 = vmul.f32 %v2110_v34, %v2106_v4 }
 0x898   : > { %v2115_v8 = vadd.f32 %v2114_v5, %v2111_v6 }
 0x89a   : > { %2117 = vrot.lane.b32.xlu0 %v2115_v8, %s3419_s1  ;;  %s2442_s1 = sshll.u32 %s987_s3, 3 }
 0x89b   : > { %s989_s4 = scalar_lea.vmem [#allocation2], %s2442_s1 }
 0x89c   : > { %s2136_s25 = sshll.u32 %s989_s4, 4  ;;  %s2137_s25 = int_to_ptr.vmem [resolvable:$true] %s2136_s25 }
 0x8be   : > { %v2051_v2 = vpop.f32.mrf.mxu3 }
 0x8bf   : > { %v2052_v14 = vadd.f32 %v2671_v12, %v2051_v2 }
 0x8c1   : > { %vm2055_vm10 = vcmp.ge.f32.partialorder %v2052_v14, 0.0  ;;  %v2056_v15 = vmul.f32 0.01, %v2052_v14 }
 0x8c3   : > { %v2057_v16 = vsel %vm2055_vm10, %v2052_v14, %v2056_v15 }
 0x8c4   : > { %v2058_v33 = vpack.c.bf16 %v2057_v16, %v2057_v16 }
 0x8c6   : > { %v2053_v46 = vpop.f32.mrf.mxu3  ;;  %2565 = vmatmul.msk.bf16.vlgmr.msra.gmra.mxu2 %vm1108_vm0, %v2058_v33 }
 0x90c   : > { %v2118_v61 = vpop.permute.xlu0 %2117 }
 0x949   : > { %v2091_v48 = vpop.f32.mrf.mxu2 }
 0x94a   : > { %v2092_v17 = vadd.f32 %v2672_v43, %v2091_v48 }
 0x94c   : > { %v2095_v21 = vmul.f32 0.5, %v2092_v17 }
 0x94e   : > { %v2097_v22 = vadd.f32 %v2096_v20, %v2095_v21 }
 0x950   : > { %v2120_v23 = vsel %vm1108_vm0, %v2097_v22, %v2118_v61 }
 0x951   : > { %v2093_v56 = vpop.f32.mrf.mxu2  ;;  %v2121_v24 = vsel %vm1139_vm1, %v2120_v23, 0.0 }
 0x952   : > { %2122 = vst [vmem:[%s989_s4] sm:$0xff] %v2121_v24 }
 0x953   : > { %2716 = shalt.err (!%p2713_p3)
}
 0x954   : > { %2599 = dma.vmem_to_hbm [thread:$0]  (%p2922_p5), %s2137_s25, 128, %s2139_s0, %s2124_s5  }
 0x955 PF: > { %s3423_s3 = sld [smem:[#allocation7_spill]] }
 0x956   : > { %s3424_s6 = sld [smem:[#allocation5_spill]] }
 0x95b   : > { %p2605_p4 = scmp.ge.s32.totalorder %s3423_s3, 2 }
 0x95c   : > { %s2150_s24 = sand.u32 1, %s3424_s6  }
 0x95d   : > { %p2602_p7 = pnand %p2605_p4, %p2926_p6  ;;  %s2151_s4 = scalar_lea.sflag [#allocation3], %s2150_s24 }
 0x95f   : > { %p2603_p8 = pneg %p2602_p7 }
 0x961   : > { %2734 = dma.done.wait (%p2603_p8), %s2151_s4, 128  }
 0x962   : > { %2736 = vsyncadd (%p2603_p8), %s2151_s4, 4294967168  ;;  %s3426_s25 = sld [smem:[#allocation8_spill]]  ;;  %s3429_s4 = smov %s2743_s30 }
 0x963   : > { %s3427_s27 = sld [smem:[#allocation6_spill]] }
 0x964   : > { %s3428_s24 = sld [smem:[#allocation9_spill]] }
 0x968   : > { %p33_p9 = scmp.ge.s32.totalorder %s3426_s25, 4  }
 0x969   : > { %s3430_s30 = smov %s3427_s27 }
 0x96a   :  { %35 = sbr.rel (!%p33_p9) target bundleno = 15 (0xf), region = 213 }
 0x96f   :  { %2157 = vsyncpa [#allocation3], 1 }
 0x970   :  { %2159 = vsyncpa [#allocation3 + $0x1], 1 }

</bundles_post_ra>
